<compile_context>
chip_gen: v7x
topology: tpu7x:2x2x1
jax: 0.10.0
libtpu: 0.0.40
codegen_flags: <defaults>
</compile_context>

<pallas_src>
import functools
import math

import jax
import jax.numpy as jnp
from jax import lax
from jax.experimental import pallas as pl
from jax.experimental.pallas import tpu as pltpu


LANE = 128            # TPU lane width; hidden dim padded to a multiple of this
MAX_EDGE_TILE = 2048  # edges per phase-1 grid step (review: 1024-2048)
MAX_NODE_TILE = 512   # node rows per phase-0 / phase-2 grid step (review: 512)


def _round_up(a, b):
    return ((a + b - 1) // b) * b


def _pad2(a, rows, cols):
    return jnp.pad(a, ((0, rows - a.shape[0]), (0, cols - a.shape[1])))


def _vmem_limit_bytes():
    # Per-generation scoped-VMEM budget: v5e/v6e have 128 MiB physical VMEM,
    # v7x only 64 MiB per TensorCore.  Leave headroom for double buffering.
    try:
        cap = int(pltpu.get_tpu_info().vmem_capacity_bytes)
    except Exception:  # unknown -> assume the smallest (v7x per-TC) budget
        cap = 64 * 1024 * 1024
    return min(96 * 1024 * 1024, (cap * 3) // 4)


# ----------------------------- kernel helpers -------------------------------

def _erf(z):
    # Abramowitz & Stegun 7.1.26 rational approximation (max abs err ~1.5e-7),
    # built only from ops Mosaic lowers (exp / mul / add / div / select).
    sign = jnp.where(z >= 0.0, 1.0, -1.0)
    a = jnp.abs(z)
    t = 1.0 / (1.0 + 0.3275911 * a)
    poly = ((((1.061405429 * t - 1.453152027) * t + 1.421413741) * t
             - 0.284496736) * t + 0.254829592) * t
    return sign * (1.0 - poly * jnp.exp(-a * a))


def _gelu_exact(x):
    # nn.GELU() default (erf-based, not tanh approximation); kept in f32.
    return 0.5 * x * (1.0 + _erf(x * (1.0 / math.sqrt(2.0))))


# ------------------- phase 0: per-node pre_ffn (hoisted) ---------------------
#   g = GELU(x @ W1 + b1)        -- depends only on the source node, so it is
#                                   computed once per node, not once per edge.

def _node_preffn_kernel(x_ref, w1_ref, b1_ref, g_ref):
    h = jnp.dot(x_ref[...], w1_ref[...], preferred_element_type=jnp.float32)
    g_ref[...] = _gelu_exact(h + b1_ref[...])


# ------------------------ phase 1: edge aggregation --------------------------
#   msg_e = g[src[e]] * bases[e]          (copy_u gather + edge gate)
#   y[n]  = sum_{e: dst[e]==n} msg_e      (update_all copy_e / sum, exact f32)
#
# src/dst are scalar-prefetched into SMEM; g is VMEM-resident; the gather and
# scatter-add are direct dynamic-row accesses (O(E*H), no O(E*N) one-hots).

def _edge_aggr_kernel(src_ref, dst_ref, g_ref, bases_ref, y_ref):
    step = pl.program_id(0)
    et = bases_ref.shape[0]          # static edge-tile size
    base = step * et                 # offset of this tile in the SMEM indices

    @pl.when(step == 0)
    def _():
        y_ref[...] = jnp.zeros(y_ref.shape, y_ref.dtype)

    def body(e, carry):
        s = src_ref[base + e]        # SMEM scalar reads
        d = dst_ref[base + e]
        msg = g_ref[pl.ds(s, 1), :] * bases_ref[pl.ds(e, 1), :]   # f32 row
        y_ref[pl.ds(d, 1), :] = y_ref[pl.ds(d, 1), :] + msg       # f32 add
        return carry

    lax.fori_loop(0, et, body, 0, unroll=8)

    # preffn_dropout: identity in eval mode


# ------------------------------ phase 2: FFN ---------------------------------
#   x1  = x + y
#   t   = ReLU(BN2(ReLU(BN1(x1 @ Wf1 + bf1)) @ Wf2 + bf2))   (BN eval-mode,
#         bias + BN folded into per-channel scale/shift on the host)
#   out = x1 + t

def _ffn_kernel(x_ref, y_ref, wf1_ref, sc1_ref, wf2_ref, sc2_ref, out_ref):
    f32 = jnp.float32
    bf16 = jnp.bfloat16

    x1 = x_ref[...] + y_ref[...]                                      # f32

    t = jnp.dot(x1.astype(bf16), wf1_ref[...], preferred_element_type=f32)
    t = jnp.maximum(t * sc1_ref[0:1, :] + sc1_ref[1:2, :], 0.0)
    t = jnp.dot(t.astype(bf16), wf2_ref[...], preferred_element_type=f32)
    t = jnp.maximum(t * sc2_ref[0:1, :] + sc2_ref[1:2, :], 0.0)

    # ffn_dropout: identity in eval mode
    out_ref[...] = (x1 + t).astype(out_ref.dtype)


# -------------------------------- wrapper ------------------------------------

def _fold_bn(bn, bias, eps=1e-5):
    # bn rows: [gamma, beta, running_mean, running_var]; bias: [1, H]
    # BN(z @ W + b) == (z @ W) * scale + shift  with:
    scale = bn[0] * jax.lax.rsqrt(bn[3] + eps)
    shift = bn[1] + (bias[0] - bn[2]) * scale
    return jnp.stack([scale, shift])          # [2, H]


def conv_forward(x_feat, src, dst, bases, params):
    f32, bf16 = jnp.float32, jnp.bfloat16
    N, H = x_feat.shape
    E = bases.shape[0]

    Hp = _round_up(H, LANE)
    node_tile = min(MAX_NODE_TILE, _round_up(N, LANE))
    Np = _round_up(N, node_tile)
    et = min(MAX_EDGE_TILE, _round_up(E, 8))
    Ep = _round_up(E, et)

    # Host-side packing: lane-dense padding, bf16 matmul operands, BN folding.
    x_f32 = _pad2(x_feat.astype(f32), Np, Hp)
    x_bf = x_f32.astype(bf16)
    # Zero-padded bases rows make padded edges contribute exactly zero.
    bases_p = _pad2(bases.astype(f32), Ep, Hp)

    src_p = jnp.pad(src.astype(jnp.int32), (0, Ep - E))
    dst_p = jnp.pad(dst.astype(jnp.int32), (0, Ep - E))

    w1_bf = _pad2(params["w1"].astype(f32), Hp, Hp).astype(bf16)
    b1_p = _pad2(params["b1"].astype(f32), 1, Hp)
    wf1_bf = _pad2(params["wf1"].astype(f32), Hp, Hp).astype(bf16)
    wf2_bf = _pad2(params["wf2"].astype(f32), Hp, Hp).astype(bf16)
    sc1 = _pad2(_fold_bn(params["bn1"], params["bf1"]).astype(f32), 2, Hp)
    sc2 = _pad2(_fold_bn(params["bn2"], params["bf2"]).astype(f32), 2, Hp)

    vmem_limit = _vmem_limit_bytes()
    parallel_params = pltpu.CompilerParams(
        dimension_semantics=("parallel",), vmem_limit_bytes=vmem_limit)
    reduce_params = pltpu.CompilerParams(
        dimension_semantics=("arbitrary",), vmem_limit_bytes=vmem_limit)

    # ---- phase 0: g = GELU(x @ W1 + b1) per node (hoisted, "parallel") ----
    g = pl.pallas_call(
        _node_preffn_kernel,
        out_shape=jax.ShapeDtypeStruct((Np, Hp), f32),
        grid=(Np // node_tile,),
        in_specs=[
            pl.BlockSpec((node_tile, Hp), lambda i: (i, 0)),   # x bf16 (tiled)
            pl.BlockSpec((Hp, Hp), lambda i: (0, 0)),          # W1 bf16 (resident)
            pl.BlockSpec((1, Hp), lambda i: (0, 0)),           # b1 (resident)
        ],
        out_specs=pl.BlockSpec((node_tile, Hp), lambda i: (i, 0)),
        compiler_params=parallel_params,
    )(x_bf, w1_bf, b1_p)

    # ---- phase 1: edge tiles (reduction) -> resident node accumulator ----
    y = pl.pallas_call(
        _edge_aggr_kernel,
        out_shape=jax.ShapeDtypeStruct((Np, Hp), f32),
        grid_spec=pltpu.PrefetchScalarGridSpec(
            num_scalar_prefetch=2,               # src, dst -> SMEM
            grid=(Ep // et,),
            in_specs=[
                pl.BlockSpec((Np, Hp), lambda i, src, dst: (0, 0)),  # g (resident)
                pl.BlockSpec((et, Hp), lambda i, src, dst: (i, 0)),  # bases (pipelined)
            ],
            out_specs=pl.BlockSpec((Np, Hp), lambda i, src, dst: (0, 0)),
        ),
        compiler_params=reduce_params,
    )(src_p, dst_p, g, bases_p)

    # ---- phase 2: residual + FFN, node-row tiles ("parallel" axis) ----
    out = pl.pallas_call(
        _ffn_kernel,
        out_shape=jax.ShapeDtypeStruct((Np, Hp), f32),
        grid=(Np // node_tile,),
        in_specs=[
            pl.BlockSpec((node_tile, Hp), lambda i: (i, 0)),   # x (tiled)
            pl.BlockSpec((node_tile, Hp), lambda i: (i, 0)),   # y (tiled)
            pl.BlockSpec((Hp, Hp), lambda i: (0, 0)),          # Wf1 (resident)
            pl.BlockSpec((2, Hp), lambda i: (0, 0)),           # scale/shift 1
            pl.BlockSpec((Hp, Hp), lambda i: (0, 0)),          # Wf2 (resident)
            pl.BlockSpec((2, Hp), lambda i: (0, 0)),           # scale/shift 2
        ],
        out_specs=pl.BlockSpec((node_tile, Hp), lambda i: (i, 0)),
        compiler_params=parallel_params,
    )(x_f32, y, wf1_bf, sc1, wf2_bf, sc2)

    return out[:N, :H]


# ------------------------- plain-JAX reference --------------------------------
# Mirrors the kernel's precision policy (bf16 matmul operands, f32 accumulation,
# f32 element-wise math, exact f32 segment sum) so the comparison is tight.

def conv_reference(x_feat, src, dst, bases, params):
    f32 = jnp.float32
    bf = lambda v: v.astype(jnp.bfloat16).astype(f32)
    dot = functools.partial(jnp.dot, precision=jax.lax.Precision.HIGHEST)

    g = jax.nn.gelu(dot(bf(x_feat), bf(params["w1"])) + params["b1"],
                    approximate=False)
    msg = g[src] * bases
    y = jax.ops.segment_sum(msg, dst, num_segments=x_feat.shape[0])
    x1 = x_feat + y

    def bn_fold(bn, bias):
        scale = bn[0] * jax.lax.rsqrt(bn[3] + 1e-5)
        shift = bn[1] + (bias[0] - bn[2]) * scale
        return scale, shift

    s1, c1 = bn_fold(params["bn1"], params["bf1"])
    s2, c2 = bn_fold(params["bn2"], params["bf2"])
    t = jnp.maximum(dot(bf(x1), bf(params["wf1"])) * s1 + c1, 0.0)
    t = jnp.maximum(dot(bf(t), bf(params["wf2"])) * s2 + c2, 0.0)
    return x1 + t


# ---------------------------------- main --------------------------------------

if __name__ == "__main__":
    N, E, H = 256, 512, 128   # nodes, edges, hidden_size (lane-dense)

    key = jax.random.PRNGKey(0)
    keys = jax.random.split(key, 14)

    x_feat = jax.random.normal(keys[0], (N, H), dtype=jnp.float32)
    bases = jax.random.normal(keys[1], (E, H), dtype=jnp.float32)
    src = jax.random.randint(keys[2], (E,), 0, N)
    dst = jax.random.randint(keys[3], (E,), 0, N)

    scale = 1.0 / math.sqrt(H)
    params = {
        # pre_ffn Linear (x @ W + b convention; deterministic synthetic init)
        "w1": jax.random.normal(keys[4], (H, H), dtype=jnp.float32) * scale,
        "b1": jax.random.normal(keys[5], (1, H), dtype=jnp.float32) * scale,
        # ffn Linear 1 / 2
        "wf1": jax.random.normal(keys[6], (H, H), dtype=jnp.float32) * scale,
        "bf1": jax.random.normal(keys[7], (1, H), dtype=jnp.float32) * scale,
        "wf2": jax.random.normal(keys[8], (H, H), dtype=jnp.float32) * scale,
        "bf2": jax.random.normal(keys[9], (1, H), dtype=jnp.float32) * scale,
        # BatchNorm1d params (eval mode), rows = [gamma, beta, mean, var]
        "bn1": jnp.stack([
            1.0 + 0.1 * jax.random.normal(keys[10], (H,), dtype=jnp.float32),
            0.1 * jax.random.normal(keys[11], (H,), dtype=jnp.float32) + 0.05,
            0.1 * jax.random.normal(keys[12], (H,), dtype=jnp.float32),
            jnp.abs(jax.random.normal(keys[13], (H,), dtype=jnp.float32)) + 0.5,
        ]),
        "bn2": jnp.stack([
            1.0 + 0.1 * jax.random.normal(keys[5], (H,), dtype=jnp.float32),
            0.1 * jax.random.normal(keys[6], (H,), dtype=jnp.float32),
            0.1 * jax.random.normal(keys[7], (H,), dtype=jnp.float32),
            jnp.abs(jax.random.normal(keys[8], (H,), dtype=jnp.float32)) + 0.5,
        ]),
    }

    out = jax.block_until_ready(conv_forward(x_feat, src, dst, bases, params))
    ref = conv_reference(x_feat, src, dst, bases, params)

    assert out.shape == (N, H) and out.dtype == jnp.float32
    assert jnp.allclose(out, ref, rtol=2e-3, atol=2e-3), (
        "mismatch vs JAX reference: max abs err = %f"
        % float(jnp.max(jnp.abs(out - ref))))

    print("KERNEL_OK")
</pallas_src>

<mosaic_0001>
module attributes {stable_mosaic.version = 11 : i64} {
  func.func @_node_preffn_kernel(%arg0: i32, %arg1: memref<256x128xbf16, #tpu.memory_space<vmem>>, %arg2: memref<128x128xbf16, #tpu.memory_space<vmem>>, %arg3: memref<1x128xf32, #tpu.memory_space<vmem>>, %arg4: memref<256x128xf32, #tpu.memory_space<vmem>>) attributes {dimension_semantics = [#tpu.dimension_semantics<parallel>], iteration_bounds = array<i64: 1>, scalar_prefetch = 0 : i64, scratch_operands = 0 : i64, tpu.core_type = #tpu.core_type<tc>, window_params = [{transform_indices = @transform_0, window_bounds = array<i64: 256, 128>}, {pipeline_mode = #tpu.pipeline_mode<synchronous>, transform_indices = @transform_1, window_bounds = array<i64: 128, 128>}, {pipeline_mode = #tpu.pipeline_mode<synchronous>, transform_indices = @transform_2, window_bounds = array<i64: 1, 128>}, {transform_indices = @transform_3, window_bounds = array<i64: 256, 128>}]} {
    %c0 = arith.constant 0 : index
    %c0_0 = arith.constant 0 : index
    %0 = vector.load %arg1[%c0, %c0_0] : memref<256x128xbf16, #tpu.memory_space<vmem>>, vector<256x128xbf16>
    %c0_1 = arith.constant 0 : index
    %c0_2 = arith.constant 0 : index
    %1 = vector.load %arg2[%c0_1, %c0_2] : memref<128x128xbf16, #tpu.memory_space<vmem>>, vector<128x128xbf16>
    %cst = arith.constant dense<0.000000e+00> : vector<256x128xf32>
    %2 = tpu.matmul %0, %1, %cst {dimension_numbers = #tpu.dot_dimension_numbers<[1], [0], [0], [1], [0, 0, 1, 1], [], []>} : vector<256x128xbf16>, vector<128x128xbf16>, vector<256x128xf32> -> vector<256x128xf32>
    %c0_3 = arith.constant 0 : index
    %c0_4 = arith.constant 0 : index
    %3 = vector.load %arg3[%c0_3, %c0_4] : memref<1x128xf32, #tpu.memory_space<vmem>>, vector<1x128xf32>
    %4 = vector.broadcast %3 : vector<1x128xf32> to vector<256x128xf32>
    %5 = arith.addf %2, %4 : vector<256x128xf32>
    %cst_5 = arith.constant 5.000000e-01 : f32
    %6 = vector.broadcast %cst_5 : f32 to vector<256x128xf32>
    %7 = arith.mulf %6, %5 : vector<256x128xf32>
    %cst_6 = arith.constant 0.707106769 : f32
    %8 = vector.broadcast %cst_6 : f32 to vector<256x128xf32>
    %9 = arith.mulf %5, %8 : vector<256x128xf32>
    %cst_7 = arith.constant 0.000000e+00 : f32
    %10 = vector.broadcast %cst_7 : f32 to vector<256x128xf32>
    %11 = arith.cmpf oge, %9, %10 : vector<256x128xf32>
    %cst_8 = arith.constant 1.000000e+00 : f32
    %cst_9 = arith.constant -1.000000e+00 : f32
    %12 = vector.broadcast %cst_8 : f32 to vector<256x128xf32>
    %13 = vector.broadcast %cst_9 : f32 to vector<256x128xf32>
    %14 = arith.select %11, %12, %13 : vector<256x128xi1>, vector<256x128xf32>
    %15 = math.absf %9 : vector<256x128xf32>
    %cst_10 = arith.constant 0.327591091 : f32
    %16 = vector.broadcast %cst_10 : f32 to vector<256x128xf32>
    %17 = arith.mulf %16, %15 : vector<256x128xf32>
    %cst_11 = arith.constant 1.000000e+00 : f32
    %18 = vector.broadcast %cst_11 : f32 to vector<256x128xf32>
    %19 = arith.addf %18, %17 : vector<256x128xf32>
    %cst_12 = arith.constant 1.000000e+00 : f32
    %20 = vector.broadcast %cst_12 : f32 to vector<256x128xf32>
    %21 = arith.divf %20, %19 : vector<256x128xf32>
    %cst_13 = arith.constant 1.06140542 : f32
    %22 = vector.broadcast %cst_13 : f32 to vector<256x128xf32>
    %23 = arith.mulf %22, %21 : vector<256x128xf32>
    %cst_14 = arith.constant 1.45315206 : f32
    %24 = vector.broadcast %cst_14 : f32 to vector<256x128xf32>
    %25 = arith.subf %23, %24 : vector<256x128xf32>
    %26 = arith.mulf %25, %21 : vector<256x128xf32>
    %cst_15 = arith.constant 1.42141378 : f32
    %27 = vector.broadcast %cst_15 : f32 to vector<256x128xf32>
    %28 = arith.addf %26, %27 : vector<256x128xf32>
    %29 = arith.mulf %28, %21 : vector<256x128xf32>
    %cst_16 = arith.constant 0.284496725 : f32
    %30 = vector.broadcast %cst_16 : f32 to vector<256x128xf32>
    %31 = arith.subf %29, %30 : vector<256x128xf32>
    %32 = arith.mulf %31, %21 : vector<256x128xf32>
    %cst_17 = arith.constant 0.254829586 : f32
    %33 = vector.broadcast %cst_17 : f32 to vector<256x128xf32>
    %34 = arith.addf %32, %33 : vector<256x128xf32>
    %35 = arith.mulf %34, %21 : vector<256x128xf32>
    %cst_18 = arith.constant 0.000000e+00 : f32
    %36 = vector.broadcast %cst_18 : f32 to vector<256x128xf32>
    %37 = arith.subf %36, %15 : vector<256x128xf32>
    %38 = arith.mulf %37, %15 : vector<256x128xf32>
    %39 = math.exp %38 : vector<256x128xf32>
    %40 = arith.mulf %35, %39 : vector<256x128xf32>
    %cst_19 = arith.constant 1.000000e+00 : f32
    %41 = vector.broadcast %cst_19 : f32 to vector<256x128xf32>
    %42 = arith.subf %41, %40 : vector<256x128xf32>
    %43 = arith.mulf %14, %42 : vector<256x128xf32>
    %cst_20 = arith.constant 1.000000e+00 : f32
    %44 = vector.broadcast %cst_20 : f32 to vector<256x128xf32>
    %45 = arith.addf %44, %43 : vector<256x128xf32>
    %46 = arith.mulf %7, %45 : vector<256x128xf32>
    %c0_21 = arith.constant 0 : index
    %c0_22 = arith.constant 0 : index
    %47 = vector.load %arg4[%c0_21, %c0_22] : memref<256x128xf32, #tpu.memory_space<vmem>>, vector<256x128xf32>
    tpu.vector_store %arg4[%c0_21, %c0_22], %46 {strides = array<i32>} : memref<256x128xf32, #tpu.memory_space<vmem>>, vector<256x128xf32>,
    return
  }
  func.func @transform_0(%arg0: i32) -> (i32, i32) {
    %c0_i32 = arith.constant 0 : i32
    %c0_i32_0 = arith.constant 0 : i32
    return %arg0, %c0_i32 : i32, i32
  }
  func.func @transform_1(%arg0: i32) -> (i32, i32) {
    %c0_i32 = arith.constant 0 : i32
    %c0_i32_0 = arith.constant 0 : i32
    %c0_i32_1 = arith.constant 0 : i32
    return %c0_i32, %c0_i32_0 : i32, i32
  }
  func.func @transform_2(%arg0: i32) -> (i32, i32) {
    %c0_i32 = arith.constant 0 : i32
    %c0_i32_0 = arith.constant 0 : i32
    %c0_i32_1 = arith.constant 0 : i32
    return %c0_i32, %c0_i32_0 : i32, i32
  }
  func.func @transform_3(%arg0: i32) -> (i32, i32) {
    %c0_i32 = arith.constant 0 : i32
    %c0_i32_0 = arith.constant 0 : i32
    return %arg0, %c0_i32 : i32, i32
  }
}

</mosaic_0001>

<bundles_post_ra>
// kernel: tpu_custom_call.1
= control target key start
LH: loop header
LB: loop body
LE: loop exit
PB: predicated region body
PF: predicated region fallthrough
CT: control target
= control target key end

     0   :  { %8 = vsyncpa [#allocation3], 0  ;;  %s2532_s0 = inlined_call_operand.hbm [shape: bf16[256,128], index: 0, kind: input, shape index: {}]   ;;  %s2533_s1 = inlined_call_operand.hbm [shape: bf16[128,128], index: 1, kind: input, shape index: {}]   ;;  %s2534_s2 = inlined_call_operand.vmem [shape: f32[1,128], index: 2, kind: input, shape index: {}]   ;;  %s2535_s3 = inlined_call_operand.hbm [shape: f32[256,128], index: 3, kind: output, shape index: {}]  }
   0x1   :  { %9 = vsyncpa [#allocation6], 0 }
   0x2   :  { %10 = vsyncpa [#allocation4], 0  ;;  %s1728_s12 = smov [#allocation2]   ;;  %s1656_s16 = scalar_lea.hbm %s2532_s0, 2048 }
   0x3   :  { %s16_s13 = sshll.u32 %s1728_s12, 4  ;;  %p1657_p0 = scmp.ne.s32.totalorder %s2532_s0, %s1656_s16  ;;  %s17_s13 = int_to_ptr.vmem [resolvable:$true] %s16_s13 }
   0x4   :  { %p1660_p1 = scmp.lt.u32.totalorder %s1656_s16, %s2532_s0 }
   0x6   :  { %p1662_p2 = pnand %p1660_p1, %p1657_p0 }
   0x8   :  { %1665 = shalt.err (!%p1662_p2)
}
   0x9   :  { %s1666_s21 = scalar_lea.vmem %s17_s13, 2048  ;;  %p1671_p4 = scmp.lt.s32.totalorder %s17_s13, %s17_s13 }
   0xa   :  { %p1667_p3 = scmp.ne.s32.totalorder %s17_s13, %s1666_s21  ;;  %p1672_p5 = scmp.lt.s32.totalorder %s1666_s21, %s1666_s21 }
   0xc   :  { %p1673_p6 = por %p1672_p5, %p1671_p4 }
   0xe   :  { %p1674_p7 = pnand %p1673_p6, %p1667_p3 }
  0x10   :  { %1677 = shalt.err (!%p1674_p7)
}
  0x11   :  { %s1729_s22 = smov 64   ;;  %s1730_s23 = smov 4  }
  0x12   :  { %22 = dma.hbm_to_vmem [thread:$0]  %s2532_s0, 2048, %s17_s13, [#allocation3], %s1729_s22, %s1729_s22, %s1730_s23  }
  0x13   :  { %s1731_s26 = smov [#allocation5]   ;;  %s1678_s30 = scalar_lea.hbm %s2533_s1, 1024 }
  0x14   :  { %s28_s27 = sshll.u32 %s1731_s26, 4  ;;  %p1679_p8 = scmp.ne.s32.totalorder %s2533_s1, %s1678_s30  ;;  %s29_s27 = int_to_ptr.vmem [resolvable:$true] %s28_s27 }
  0x15   :  { %p1682_p9 = scmp.lt.u32.totalorder %s1678_s30, %s2533_s1 }
  0x17   :  { %p1684_p10 = pnand %p1682_p9, %p1679_p8 }
  0x19   :  { %1687 = shalt.err (!%p1684_p10)
}
  0x1a   :  { %s1688_s8 = scalar_lea.vmem %s29_s27, 1024  ;;  %p1693_p12 = scmp.lt.s32.totalorder %s29_s27, %s29_s27 }
  0x1b   :  { %p1689_p11 = scmp.ne.s32.totalorder %s29_s27, %s1688_s8  ;;  %p1694_p13 = scmp.lt.s32.totalorder %s1688_s8, %s1688_s8 }
  0x1d   :  { %p1695_p0 = por %p1694_p13, %p1693_p12 }
  0x1f   :  { %p1696_p1 = pnand %p1695_p0, %p1689_p11 }
  0x21   :  { %1699 = shalt.err (!%p1696_p1)
}
  0x22   :  { %34 = dma.hbm_to_vmem [thread:$0]  %s2533_s1, 1024, %s29_s27, [#allocation6], %s1729_s22, %s1729_s22, %s1730_s23  }
  0x23   :  { %1722 = dma.done.wait [#allocation3], 2048  }
  0x24   :  { %1723 = vsyncadd [#allocation3], 4294965248 }
  0x25   :  { %1724 = dma.done.wait [#allocation6], 1024  }
  0x26   :  { %1725 = vsyncadd [#allocation6], 4294966272  ;;  %v1503_v0 = vld [vmem:[#allocation5] sm:$0xff]   ;;  %v1504_v1 = vld [vmem:[#allocation5 + $0x8] sm:$0xff]  }
  0x27   :  { %1431 = vmatprep.subr.bf16.mxu0 %v1503_v0  ;;  %1479 = vmatprep.subr.bf16.mxu1 %v1503_v0  ;;  %v1505_v2 = vld [vmem:[#allocation5 + $0x10] sm:$0xff]   ;;  %v1506_v3 = vld [vmem:[#allocation5 + $0x18] sm:$0xff]   ;;  %v1511_v4 = vld [vmem:[#allocation2] sm:$0xff]  }
  0x28   :  { %1432 = vmatpush3.bf16.msra.mxu0 %v1503_v0  ;;  %1487 = vmatpush3.bf16.msra.mxu1 %v1503_v0  ;;  %v1512_v5 = vld [vmem:[#allocation2 + $0x40] sm:$0xff]   ;;  %v1508_v7 = vld [vmem:[#allocation5 + $0x28] sm:$0xff]   ;;  %v1509_v8 = vld [vmem:[#allocation5 + $0x30] sm:$0xff]  }
  0x29   :  { %1433 = vmatprep.subr.bf16.mxu0 %v1504_v1  ;;  %1480 = vmatprep.subr.bf16.mxu1 %v1504_v1  ;;  %v1507_v6 = vld [vmem:[#allocation5 + $0x20] sm:$0xff]   ;;  %v1510_v9 = vld [vmem:[#allocation5 + $0x38] sm:$0xff]   ;;  %v1513_v10 = vld [vmem:[#allocation2 + $0x8] sm:$0xff]  }
  0x2a   :  { %1447 = vmatprep.mubr.bf16.mxu0 %v1511_v4  ;;  %1463 = vmatprep.mubr.bf16.mxu1 %v1512_v5  ;;  %v1514_v11 = vld [vmem:[#allocation2 + $0x48] sm:$0xff]   ;;  %v1515_v12 = vld [vmem:[#allocation2 + $0x10] sm:$0xff]   ;;  %v1517_v14 = vld [vmem:[#allocation2 + $0x18] sm:$0xff]  }
  0x2b   :  { %v1516_v13 = vld [vmem:[#allocation2 + $0x50] sm:$0xff]   ;;  %v1518_v15 = vld [vmem:[#allocation2 + $0x58] sm:$0xff]   ;;  %v1519_v16 = vld [vmem:[#allocation2 + $0x20] sm:$0xff]  }
  0x2c   :  { %1434 = vmatpush3.bf16.msra.mxu0 %v1504_v1  ;;  %1488 = vmatpush3.bf16.msra.mxu1 %v1504_v1  ;;  %v1520_v17 = vld [vmem:[#allocation2 + $0x60] sm:$0xff]   ;;  %v1521_v18 = vld [vmem:[#allocation2 + $0x28] sm:$0xff]   ;;  %v1523_v20 = vld [vmem:[#allocation2 + $0x30] sm:$0xff]  }
  0x2d   :  { %1435 = vmatprep.subr.bf16.mxu0 %v1505_v2  ;;  %1481 = vmatprep.subr.bf16.mxu1 %v1505_v2  ;;  %v1522_v19 = vld [vmem:[#allocation2 + $0x68] sm:$0xff]   ;;  %v1524_v21 = vld [vmem:[#allocation2 + $0x70] sm:$0xff]   ;;  %v1525_v22 = vld [vmem:[#allocation2 + $0x38] sm:$0xff]  }
  0x2e   :  { %v1526_v23 = vld [vmem:[#allocation2 + $0x78] sm:$0xff]   ;;  %v1783_v24 = vld [vmem:[%s2534_s2] ss:$0 sm:$0xff] }
  0x30   :  { %1436 = vmatpush3.bf16.msra.mxu0 %v1505_v2  ;;  %1489 = vmatpush3.bf16.msra.mxu1 %v1505_v2 }
  0x31   :  { %1437 = vmatprep.subr.bf16.mxu0 %v1506_v3  ;;  %1482 = vmatprep.subr.bf16.mxu1 %v1506_v3 }
  0x34   :  { %1438 = vmatpush3.bf16.msra.mxu0 %v1506_v3  ;;  %1490 = vmatpush3.bf16.msra.mxu1 %v1506_v3 }
  0x35   :  { %1439 = vmatprep.subr.bf16.mxu0 %v1507_v6  ;;  %1483 = vmatprep.subr.bf16.mxu1 %v1507_v6 }
  0x38   :  { %1440 = vmatpush3.bf16.msra.mxu0 %v1507_v6  ;;  %1491 = vmatpush3.bf16.msra.mxu1 %v1507_v6 }
  0x39   :  { %1441 = vmatprep.subr.bf16.mxu0 %v1508_v7  ;;  %1484 = vmatprep.subr.bf16.mxu1 %v1508_v7 }
  0x3c   :  { %1442 = vmatpush3.bf16.msra.mxu0 %v1508_v7  ;;  %1492 = vmatpush3.bf16.msra.mxu1 %v1508_v7  ;;  %v2536_v7 = vmov -1.0  }
  0x3d   :  { %1443 = vmatprep.subr.bf16.mxu0 %v1509_v8  ;;  %1485 = vmatprep.subr.bf16.mxu1 %v1509_v8 }
  0x40   :  { %1444 = vmatpush3.bf16.msra.mxu0 %v1509_v8  ;;  %1493 = vmatpush3.bf16.msra.mxu1 %v1509_v8 }
  0x41   :  { %1445 = vmatprep.subr.bf16.mxu0 %v1510_v9  ;;  %1486 = vmatprep.subr.bf16.mxu1 %v1510_v9 }
  0x44   :  { %1446 = vmatpush3.bf16.msra.mxu0 %v1510_v9  ;;  %1494 = vmatpush3.bf16.msra.mxu1 %v1510_v9 }
  0x47   :  { %1448 = vmatmul.mubr.bf16.vlgmr.msra.gmra.mrb[0].mxu0 %v1513_v10  ;;  %1464 = vmatmul.mubr.bf16.vlgmr.msra.gmra.mrb[0].mxu1 %v1514_v11 }
  0x48   :  { %1451 = vmatprep.mubr.bf16.mxu0 %v1515_v12  ;;  %1467 = vmatprep.mubr.bf16.mxu1 %v1516_v13 }
  0x4f   :  { %1452 = vmatmul.mubr.bf16.gmra.mrb[4].mxu0 %v1517_v14  ;;  %1468 = vmatmul.mubr.bf16.gmra.mrb[4].mxu1 %v1518_v15 }
  0x50   :  { %1455 = vmatprep.mubr.bf16.mxu0 %v1519_v16  ;;  %1471 = vmatprep.mubr.bf16.mxu1 %v1520_v17 }
  0x57   :  { %1456 = vmatmul.mubr.bf16.gmra.mrb[8].mxu0 %v1521_v18  ;;  %1472 = vmatmul.mubr.bf16.gmra.mrb[8].mxu1 %v1522_v19 }
  0x58   :  { %1459 = vmatprep.mubr.bf16.mxu0 %v1523_v20  ;;  %1475 = vmatprep.mubr.bf16.mxu1 %v1524_v21 }
  0x5f   :  { %1460 = vmatmul.mubr.bf16.gmra.mrb[12].mxu0 %v1525_v22  ;;  %1476 = vmatmul.mubr.bf16.gmra.mrb[12].mxu1 %v1526_v23 }
 0x11a   :  { %v1449_v25 = vpop.f32.mrb[0].mxu0  ;;  %v1465_v26 = vpop.f32.mrb[0].mxu1 }
 0x11b   :  { %v286_v27 = vadd.f32 %v1449_v25, %v1783_v24  ;;  %v350_v28 = vadd.f32 %v1465_v26, %v1783_v24  ;;  %v277_v29 = vpop.f32.mrb[1].mxu0  ;;  %v341_v30 = vpop.f32.mrb[1].mxu1 }
 0x11c   :  { %v278_v31 = vadd.f32 %v1783_v24, %v277_v29  ;;  %v342_v32 = vadd.f32 %v1783_v24, %v341_v30  ;;  %v1450_v33 = vpop.f32.mrb[2].mxu0  ;;  %v1466_v34 = vpop.f32.mrb[2].mxu1 }
 0x11d   :  { %v438_v35 = vmul.f32 0.70710677, %v286_v27  ;;  %v454_v36 = vmul.f32 0.70710677, %v350_v28  ;;  %v280_v42 = vpop.f32.mrb[3].mxu0  ;;  %v344_v47 = vpop.f32.mrb[3].mxu1  ;;  %v1807_v60 = vadd.f32 %v1450_v33, %v1783_v24  ;;  %v1819_v5 = vadd.f32 %v1466_v34, %v1783_v24 }
 0x11e   :  { %v436_v37 = vmul.f32 0.70710677, %v278_v31  ;;  %v1789_v41 = vmul.f32 0.70710677, %v342_v32  ;;  %v1791_v48 = vmul.f32 0.5, %v286_v27  ;;  %v1793_v50 = vmul.f32 0.5, %v350_v28 }
 0x11f   :  { %v534_v38 = vand.u32 2147483647, %v438_v35  ;;  %v550_v39 = vand.u32 2147483647, %v454_v36  ;;  %vm470_vm0 = vcmp.ge.f32.partialorder %v438_v35, 0.0  ;;  %v1799_v54 = vmul.f32 0.5, %v278_v31 }
 0x120   :  { %v532_v40 = vand.u32 2147483647, %v436_v37  ;;  %v548_v55 = vand.u32 2147483647, %v1789_v41  ;;  %vm486_vm1 = vcmp.ge.f32.partialorder %v454_v36, 0.0  ;;  %v1825_v8 = vsel %vm470_vm0, 1.0, %v2536_v7 }
 0x121   :  { %v566_v43 = vmul.f32 0.3275911, %v534_v38  ;;  %v582_v44 = vmul.f32 0.3275911, %v550_v39  ;;  %v982_v45 = vsub.f32 0.0, %v534_v38  ;;  %v998_v58 = vsub.f32 0.0, %v550_v39 }
 0x122   :  { %v564_v46 = vmul.f32 0.3275911, %v532_v40  ;;  %v1795_v52 = vpop.f32.mrb[4].mxu0  ;;  %v1797_v53 = vpop.f32.mrb[4].mxu1  ;;  %v980_v0 = vsub.f32 0.0, %v532_v40  ;;  %v996_v3 = vsub.f32 0.0, %v548_v55  ;;  %v1830_v11 = vadd.f32 %v1783_v24, %v280_v42 }
 0x123   :  { %v598_v49 = vadd.f32 1.0, %v566_v43  ;;  %v614_v51 = vadd.f32 1.0, %v582_v44  ;;  %v1802_v56 = vpop.f32.mrb[5].mxu0  ;;  %v1804_v57 = vpop.f32.mrb[5].mxu1  ;;  %v1014_v63 = vmul.f32 %v982_v45, %v534_v38  ;;  %v580_v1 = vmul.f32 0.3275911, %v548_v55 }
 0x124   :  { %v596_v59 = vadd.f32 1.0, %v564_v46  ;;  %v1809_v61 = vpop.f32.mrb[6].mxu0  ;;  %v1811_v62 = vpop.f32.mrb[6].mxu1  ;;  %v1816_v4 = vmul.f32 0.70710677, %v1807_v60  ;;  %v1827_v9 = vmul.f32 0.5, %v342_v32  ;;  %v1030_v12 = vmul.f32 %v998_v58, %v550_v39 }
 0x125   :  { %1527 = vrcp.f32 %v598_v49  ;;  %v1813_v2 = vpop.f32.mrb[7].mxu0  ;;  %v1821_v6 = vpop.f32.mrb[7].mxu1  ;;  %v612_v10 = vadd.f32 1.0, %v580_v1  ;;  %vm468_vm2 = vcmp.ge.f32.partialorder %v436_v37, 0.0  ;;  %v1048_v14 = vmul.f32 1.442695, %v1014_v63 }
 0x126   :  { %1529 = vrcp.f32 %v614_v51  ;;  %v535_v13 = vand.u32 2147483647, %v1816_v4  ;;  %v1834_v15 = vsel %vm486_vm1, 1.0, %v2536_v7  ;;  %v1012_v16 = vmul.f32 %v980_v0, %v532_v40 }
 0x127   :  { %1531 = vrcp.f32 %v596_v59  ;;  %v1837_v17 = vmul.f32 0.70710677, %v1819_v5  ;;  %v1028_v19 = vmul.f32 %v996_v3, %v548_v55  ;;  %v1846_v25 = vsel %vm468_vm2, 1.0, %v2536_v7 }
 0x128   :  { %1533 = vrcp.f32 %v612_v10  ;;  %v567_v20 = vmul.f32 0.3275911, %v535_v13  ;;  %v983_v21 = vsub.f32 0.0, %v535_v13  ;;  %v1850_v27 = vmul.f32 0.70710677, %v1830_v11 }
 0x129   :  { %v551_v26 = vand.u32 2147483647, %v1837_v17  ;;  %v1080_v29 = vmul.f32 1.442695, %v1030_v12  ;;  %vm484_vm3 = vcmp.ge.f32.partialorder %v1789_v41, 0.0  ;;  %v1856_v31 = vadd.f32 %v1783_v24, %v344_v47 }
 0x12a   :  { %v1839_v18 = vpop.f32.mrb[8].mxu0  ;;  %v1841_v22 = vpop.f32.mrb[8].mxu1  ;;  %v599_v30 = vadd.f32 1.0, %v567_v20  ;;  %v1015_v34 = vmul.f32 %v983_v21, %v535_v13  ;;  %v533_v37 = vand.u32 2147483647, %v1850_v27  ;;  %v1883_v12 = vsel %vm484_vm3, 1.0, %v2536_v7 }
 0x12b   :  { %v1843_v23 = vpop.f32.mrb[9].mxu0  ;;  %v1852_v28 = vpop.f32.mrb[9].mxu1  ;;  %v583_v35 = vmul.f32 0.3275911, %v551_v26  ;;  %v999_v36 = vsub.f32 0.0, %v551_v26  ;;  %vm471_vm4 = vcmp.ge.f32.partialorder %v1816_v4, 0.0 }
 0x12c   :  { %v1858_v32 = vpop.f32.mrb[10].mxu0  ;;  %v1860_v33 = vpop.f32.mrb[10].mxu1  ;;  %v1044_v39 = vmul.f32 1.442695, %v1012_v16  ;;  %v1076_v40 = vmul.f32 1.442695, %v1028_v19  ;;  %1535 = vrcp.f32 %v599_v30 }
 0x12d   :  { %2538 = vst [vmem:[#allocation11_spill] sm:$0xff] %v1858_v32  ;;  %2539 = vst [vmem:[#allocation12_spill] sm:$0xff] %v1860_v33  ;;  %v1865_v42 = vpop.f32.mrb[11].mxu0  ;;  %v1867_v43 = vpop.f32.mrb[11].mxu1  ;;  %v615_v46 = vadd.f32 1.0, %v583_v35  ;;  %v1031_v47 = vmul.f32 %v999_v36, %v551_v26  ;;  %1537 = vpow2.f32 %v1048_v14  ;;  %v981_v55 = vsub.f32 0.0, %v533_v37 }
 0x12e   :  { %2540 = vst [vmem:[#allocation13_spill] sm:$0xff] %v1865_v42  ;;  %2541 = vst [vmem:[#allocation14_spill] sm:$0xff] %v1867_v43  ;;  %v565_v49 = vmul.f32 0.3275911, %v533_v37  ;;  %v1874_v58 = vmul.f32 0.70710677, %v1856_v31 }
 0x12f   :  { %v1863_v38 = vpop.eup %1527  ;;  %v1050_v63 = vmul.f32 1.442695, %v1015_v34  ;;  %1539 = vrcp.f32 %v615_v46  ;;  %v1082_v20 = vmul.f32 1.442695, %v1031_v47  ;;  %v1013_v41 = vmul.f32 %v981_v55, %v533_v37 }
 0x130   :  { %v1869_v44 = vpop.eup %1529  ;;  %v694_v45 = vmul.f32 1.0614054, %v1863_v38  ;;  %v597_v0 = vadd.f32 1.0, %v565_v49  ;;  %1541 = vpow2.f32 %v1080_v29  ;;  %v549_v13 = vand.u32 2147483647, %v1874_v58 }
 0x131   :  { %v710_v51 = vmul.f32 1.0614054, %v1869_v44  ;;  %v1878_v3 = vpop.eup %1531  ;;  %1543 = vpow2.f32 %v1044_v39  ;;  %v1898_v39 = vadd.f32 %v1795_v52, %v1783_v24  ;;  %vm487_vm5 = vcmp.ge.f32.partialorder %v1837_v17, 0.0 }
 0x132   :  { %v1345_v59 = vadd.f32 -1.4531521, %v694_v45  ;;  %v1876_v1 = vpop.f32.mrb[12].mxu0  ;;  %v1886_v14 = vpop.f32.mrb[12].mxu1  ;;  %v692_v19 = vmul.f32 1.0614054, %v1878_v3  ;;  %1545 = vrcp.f32 %v597_v0 }
 0x133   :  { %2542 = vst [vmem:[#allocation15_spill] sm:$0xff] %v1876_v1  ;;  %v1361_v10 = vadd.f32 -1.4531521, %v710_v51  ;;  %2543 = vst [vmem:[#allocation16_spill] sm:$0xff] %v1886_v14  ;;  %v1890_v21 = vpop.f32.mrb[13].mxu0  ;;  %v1892_v26 = vpop.eup %1533  ;;  %1547 = vpow2.f32 %v1076_v40  ;;  %v997_v49 = vsub.f32 0.0, %v549_v13 }
 0x134   :  { %v758_v16 = vmul.f32 %v1863_v38, %v1345_v59  ;;  %2544 = vst [vmem:[#allocation17_spill] sm:$0xff] %v1890_v21  ;;  %v581_v30 = vmul.f32 0.3275911, %v549_v13  ;;  %v1343_v35 = vadd.f32 -1.4531521, %v692_v19  ;;  %1549 = vpow2.f32 %v1050_v63  ;;  %v1941_v33 = vpop.f32.mrb[14].mxu0 }
 0x135   :  { %v774_v29 = vmul.f32 %v1869_v44, %v1361_v10  ;;  %v708_v36 = vmul.f32 1.0614054, %v1892_v26  ;;  %v1046_v0 = vmul.f32 1.442695, %v1013_v41  ;;  %v1029_v40 = vmul.f32 %v997_v49, %v549_v13  ;;  %v1905_v10 = vpop.f32.mrb[13].mxu1  ;;  %2546 = vst [vmem:[#allocation19_spill] sm:$0xff] %v1941_v33 }
 0x136   :  { %v790_v34 = vadd.f32 1.4214138, %v758_v16  ;;  %v613_v46 = vadd.f32 1.0, %v581_v30  ;;  %v756_v51 = vmul.f32 %v1878_v3, %v1343_v35  ;;  %v1902_v37 = vpop.eup %1535  ;;  %2545 = vst [vmem:[#allocation18_spill] sm:$0xff] %v1905_v10  ;;  %v1910_v63 = vmul.f32 0.70710677, %v1898_v39 }
 0x137   :  { %v806_v45 = vadd.f32 1.4214138, %v774_v29  ;;  %v1359_v59 = vadd.f32 -1.4531521, %v708_v36  ;;  %v695_v29 = vmul.f32 1.0614054, %v1902_v37  ;;  %v1538_v30 = vpop.eup %1537 }
 0x138   :  { %v822_v47 = vmul.f32 %v1863_v38, %v790_v34  ;;  %1551 = vrcp.f32 %v613_v46  ;;  %v788_v19 = vadd.f32 1.4214138, %v756_v51  ;;  %v1078_v35 = vmul.f32 1.442695, %v1029_v40 }
 0x139   :  { %v838_v55 = vmul.f32 %v1869_v44, %v806_v45  ;;  %v772_v52 = vmul.f32 %v1892_v26, %v1359_v59  ;;  %1553 = vpow2.f32 %v1082_v20  ;;  %v1912_v36 = vpop.eup %1539  ;;  %v1346_v46 = vadd.f32 -1.4531521, %v695_v29 }
 0x13a   :  { %v1377_v16 = vadd.f32 -0.28449672, %v822_v47  ;;  %v820_v13 = vmul.f32 %v1878_v3, %v788_v19  ;;  %v1542_v49 = vpop.eup %1541  ;;  %v711_v51 = vmul.f32 1.0614054, %v1912_v36  ;;  %1555 = vpow2.f32 %v1046_v0 }
 0x13b   :  { %v1393_v34 = vadd.f32 -0.28449672, %v838_v55  ;;  %v804_v45 = vadd.f32 1.4214138, %v772_v52  ;;  %v1920_v20 = vadd.f32 %v1797_v53, %v1783_v24  ;;  %v1544_v59 = vpop.eup %1543  ;;  %1557 = vpow2.f32 %v1078_v35 }
 0x13c   :  { %v886_v41 = vmul.f32 %v1863_v38, %v1377_v16  ;;  %v1375_v40 = vadd.f32 -0.28449672, %v820_v13  ;;  %v759_v16 = vmul.f32 %v1902_v37, %v1346_v46  ;;  %v1924_v19 = vpop.eup %1545  ;;  %v1362_v29 = vadd.f32 -1.4531521, %v711_v51 }
 0x13d   :  { %v902_v47 = vmul.f32 %v1869_v44, %v1393_v34  ;;  %v836_v7 = vmul.f32 %v1892_v26, %v804_v45  ;;  %v1927_v34 = vand.u32 2147483647, %v1910_v63  ;;  %v1548_v0 = vpop.eup %1547  ;;  %v693_v46 = vmul.f32 1.0614054, %v1924_v19 }
 0x13e   :  { %v918_v55 = vadd.f32 0.2548296, %v886_v41  ;;  %v884_v53 = vmul.f32 %v1878_v3, %v1375_v40  ;;  %v791_v41 = vadd.f32 1.4214138, %v759_v16  ;;  %v775_v45 = vmul.f32 %v1912_v36, %v1362_v29  ;;  %v1550_v51 = vpop.eup %1549 }
 0x13f   :  { %v934_v52 = vadd.f32 0.2548296, %v902_v47  ;;  %v1391_v21 = vadd.f32 -0.28449672, %v836_v7  ;;  %v570_v47 = vmul.f32 0.3275911, %v1927_v34 }
 0x140   :  { %v950_v10 = vmul.f32 %v1863_v38, %v918_v55  ;;  %v916_v14 = vadd.f32 0.2548296, %v884_v53  ;;  %v823_v43 = vmul.f32 %v1902_v37, %v791_v41  ;;  %v807_v7 = vadd.f32 1.4214138, %v775_v45 }
 0x141   :  { %v966_v13 = vmul.f32 %v1869_v44, %v934_v52  ;;  %v900_v1 = vmul.f32 %v1892_v26, %v1391_v21  ;;  %v1344_v40 = vadd.f32 -1.4531521, %v693_v46  ;;  %v602_v16 = vadd.f32 1.0, %v570_v47 }
 0x142   :  { %v1110_v35 = vmul.f32 %v1538_v30, %v950_v10  ;;  %v1937_v38 = vpop.eup %1551  ;;  %v948_v52 = vmul.f32 %v1878_v3, %v916_v14  ;;  %v1378_v42 = vadd.f32 -0.28449672, %v823_v43  ;;  %v839_v21 = vmul.f32 %v1912_v36, %v807_v7 }
 0x143   :  { %v1126_v55 = vmul.f32 %v1542_v49, %v966_v13  ;;  %v932_v29 = vadd.f32 0.2548296, %v900_v1  ;;  %v1554_v10 = vpop.eup %1553  ;;  %v757_v53 = vmul.f32 %v1924_v19, %v1344_v40  ;;  %v709_v49 = vmul.f32 1.0614054, %v1937_v38 }
 0x144   :  { %v1142_v44 = vsub.f32 1.0, %v1110_v35  ;;  %v1108_v13 = vmul.f32 %v1544_v59, %v948_v52  ;;  %v887_v1 = vmul.f32 %v1902_v37, %v1378_v42  ;;  %v1556_v3 = vpop.eup %1555  ;;  %v1394_v14 = vadd.f32 -0.28449672, %v839_v21  ;;  %v1955_v42 = vpop.f32.mrb[14].mxu1 }
 0x145   :  { %v1158_v30 = vsub.f32 1.0, %v1126_v55  ;;  %v964_v45 = vmul.f32 %v1892_v26, %v932_v29  ;;  %v789_v46 = vadd.f32 1.4214138, %v757_v53  ;;  %v1360_v47 = vadd.f32 -1.4531521, %v709_v49  ;;  %v1950_v40 = vpop.eup %1557 }
 0x146   :  { %v1174_v41 = vmul.f32 %v1142_v44, %v1825_v8  ;;  %v1140_v55 = vsub.f32 1.0, %v1108_v13  ;;  %v919_v33 = vadd.f32 0.2548296, %v887_v1  ;;  %v903_v8 = vmul.f32 %v1912_v36, %v1394_v14 }
 0x147   :  { %v1190_v43 = vmul.f32 %v1158_v30, %v1834_v15  ;;  %v1124_v7 = vmul.f32 %v1548_v0, %v964_v45  ;;  %v821_v59 = vmul.f32 %v1924_v19, %v789_v46  ;;  %v773_v26 = vmul.f32 %v1937_v38, %v1360_v47 }
 0x148   :  { %v1206_v35 = vadd.f32 1.0, %v1174_v41  ;;  %v1172_v44 = vmul.f32 %v1140_v55, %v1846_v25  ;;  %v951_v29 = vmul.f32 %v1902_v37, %v919_v33  ;;  %v935_v30 = vadd.f32 0.2548296, %v903_v8 }
 0x149   :  { %v1222_v32 = vadd.f32 1.0, %v1190_v43  ;;  %v1156_v52 = vsub.f32 1.0, %v1124_v7  ;;  %v1376_v21 = vadd.f32 -0.28449672, %v821_v59  ;;  %v805_v53 = vadd.f32 1.4214138, %v773_v26 }
 0x14a   :  { %v1238_v15 = vmul.f32 %v1206_v35, %v1791_v48  ;;  %v1204_v49 = vadd.f32 1.0, %v1172_v44  ;;  %v1111_v13 = vmul.f32 %v1550_v51, %v951_v29  ;;  %1559 = vrcp.f32 %v602_v16 }
 0x14b   :  { %v1254_v0 = vmul.f32 %v1222_v32, %v1793_v50  ;;  %v1188_v41 = vmul.f32 %v1156_v52, %v1883_v12  ;;  %v967_v48 = vmul.f32 %v1912_v36, %v935_v30  ;;  %v885_v25 = vmul.f32 %v1924_v19, %v1376_v21  ;;  %v1974_v36 = vpop.f32.mrb[15].mxu0 }
 0x14c   :  { %1270 = vst [vmem:[#allocation7 + $0x10] sm:$0xff] %v1238_v15  ;;  %v837_v33 = vmul.f32 %v1937_v38, %v805_v53  ;;  %v1236_v50 = vmul.f32 %v1204_v49, %v1799_v54  ;;  %v1143_v37 = vsub.f32 1.0, %v1111_v13  ;;  %v1969_v45 = vadd.f32 %v1783_v24, %v1802_v56 }
 0x14d   :  { %1286 = vst [vmem:[#allocation7 + $0x90] sm:$0xff] %v1254_v0  ;;  %v1220_v32 = vadd.f32 1.0, %v1188_v41  ;;  %v2547_v12 = vmov -1.0   ;;  %v1127_v16 = vmul.f32 %v1554_v10, %v967_v48  ;;  %v917_v1 = vadd.f32 0.2548296, %v885_v25  ;;  %v1995_v0 = vpop.f32.mrb[15].mxu1 }
 0x14e   :  { %v503_v51 = vsel %vm471_vm4, 1.0, %v2547_v12  ;;  %v1392_v43 = vadd.f32 -0.28449672, %v837_v33  ;;  %1268 = vst [vmem:[#allocation7] sm:$0xff] %v1236_v50  ;;  %v407_v54 = vmul.f32 0.5, %v1807_v60  ;;  %v519_v56 = vsel %vm487_vm5, 1.0, %v2547_v12 }
 0x14f   :  { %v1252_v14 = vmul.f32 %v1220_v32, %v1827_v9  ;;  %v1175_v46 = vmul.f32 %v1143_v37, %v503_v51  ;;  %v1979_v47 = vmul.f32 0.70710677, %v1920_v20  ;;  %v1159_v4 = vsub.f32 1.0, %v1127_v16 }
 0x150   :  { %v949_v10 = vmul.f32 %v1924_v19, %v917_v1  ;;  %v901_v35 = vmul.f32 %v1937_v38, %v1392_v43  ;;  %v986_v7 = vsub.f32 0.0, %v1927_v34  ;;  %v1989_v60 = vmul.f32 0.70710677, %v1969_v45 }
 0x151   :  { %1284 = vst [vmem:[#allocation7 + $0x80] sm:$0xff] %v1252_v14  ;;  %v1207_v55 = vadd.f32 1.0, %v1175_v46  ;;  %v554_v9 = vand.u32 2147483647, %v1979_v47  ;;  %v1191_v8 = vmul.f32 %v1159_v4, %v519_v56  ;;  %vm469_vm6 = vcmp.ge.f32.partialorder %v1850_v27, 0.0 }
 0x152   :  { %v1109_v59 = vmul.f32 %v1556_v3, %v949_v10  ;;  %v933_v17 = vadd.f32 0.2548296, %v901_v35  ;;  %v423_v15 = vmul.f32 0.5, %v1819_v5  ;;  %vm485_vm7 = vcmp.ge.f32.partialorder %v1874_v58, 0.0 }
 0x153   :  { %v1239_v26 = vmul.f32 %v1207_v55, %v407_v54  ;;  %v586_v19 = vmul.f32 0.3275911, %v554_v9  ;;  %v1223_v44 = vadd.f32 1.0, %v1191_v8  ;;  %v501_v21 = vsel %vm469_vm6, 1.0, %v2547_v12 }
 0x154   :  { %v1141_v52 = vsub.f32 1.0, %v1109_v59  ;;  %v965_v29 = vmul.f32 %v1937_v38, %v933_v17  ;;  %v1997_v30 = vpop.eup %1559  ;;  %v1018_v27 = vmul.f32 %v986_v7, %v1927_v34  ;;  %v536_v53 = vand.u32 2147483647, %v1989_v60 }
 0x155   :  { %1271 = vst [vmem:[#allocation7 + $0x18] sm:$0xff] %v1239_v26  ;;  %v618_v3 = vadd.f32 1.0, %v586_v19  ;;  %v1255_v5 = vmul.f32 %v1223_v44, %v423_v15  ;;  %v698_v58 = vmul.f32 1.0614054, %v1997_v30  ;;  %v405_v38 = vmul.f32 0.5, %v1830_v11 }
 0x156   :  { %v1173_v49 = vmul.f32 %v1141_v52, %v501_v21  ;;  %v1125_v41 = vmul.f32 %v1950_v40, %v965_v29  ;;  %v517_v13 = vsel %vm485_vm7, 1.0, %v2547_v12  ;;  %v568_v48 = vmul.f32 0.3275911, %v536_v53 }
 0x157   :  { %1561 = vrcp.f32 %v618_v3  ;;  %1287 = vst [vmem:[#allocation7 + $0x98] sm:$0xff] %v1255_v5  ;;  %v1349_v50 = vadd.f32 -1.4531521, %v698_v58  ;;  %v358_v34 = vadd.f32 %v1783_v24, %v1804_v57  ;;  %v1056_v32 = vmul.f32 1.442695, %v1018_v27 }
 0x158   :  { %v1205_v25 = vadd.f32 1.0, %v1173_v49  ;;  %v1157_v33 = vsub.f32 1.0, %v1125_v41  ;;  %v1002_v37 = vsub.f32 0.0, %v554_v9  ;;  %v600_v51 = vadd.f32 1.0, %v568_v48 }
 0x159   :  { %v2010_v40 = vadd.f32 %v1809_v61, %v1783_v24  ;;  %v762_v1 = vmul.f32 %v1997_v30, %v1349_v50  ;;  %v421_v43 = vmul.f32 0.5, %v1856_v31  ;;  %vm474_vm8 = vcmp.ge.f32.partialorder %v1910_v63, 0.0 }
 0x15a   :  { %v1237_v16 = vmul.f32 %v1205_v25, %v405_v38  ;;  %v1189_v11 = vmul.f32 %v1157_v33, %v517_v13  ;;  %1563 = vrcp.f32 %v600_v51  ;;  %v2015_v14 = vmul.f32 0.70710677, %v358_v34 }
 0x15b   :  { %v794_v54 = vadd.f32 1.4214138, %v762_v1  ;;  %v2018_v46 = vmul.f32 0.70710677, %v2010_v40  ;;  %v2022_v61 = vadd.f32 %v1811_v62, %v1783_v24  ;;  %1565 = vpow2.f32 %v1056_v32 }
 0x15c   :  { %1269 = vst [vmem:[#allocation7 + $0x8] sm:$0xff] %v1237_v16  ;;  %v1221_v57 = vadd.f32 1.0, %v1189_v11  ;;  %v1034_v56 = vmul.f32 %v1002_v37, %v554_v9  ;;  %v552_v4 = vand.u32 2147483647, %v2015_v14  ;;  %v2026_v63 = vmul.f32 0.5, %v1898_v39 }
 0x15d   :  { %v826_v10 = vmul.f32 %v1997_v30, %v794_v54  ;;  %v506_v35 = vsel %vm474_vm8, 1.0, %v2547_v12  ;;  %v984_v55 = vsub.f32 0.0, %v536_v53  ;;  %v539_v8 = vand.u32 2147483647, %v2018_v46 }
 0x15e   :  { %v1253_v31 = vmul.f32 %v1221_v57, %v421_v43  ;;  %v584_v7 = vmul.f32 0.3275911, %v552_v4  ;;  %v2032_v62 = vmul.f32 0.5, %v1920_v20  ;;  %vm490_vm9 = vcmp.ge.f32.partialorder %v1979_v47, 0.0 }
 0x15f   :  { %v1381_v59 = vadd.f32 -0.28449672, %v826_v10  ;;  %v2036_v9 = vmul.f32 0.70710677, %v2022_v61  ;;  %v1088_v17 = vmul.f32 1.442695, %v1034_v56  ;;  %v2042_v19 = vadd.f32 %v1783_v24, %v1813_v2 }
 0x160   :  { %1285 = vst [vmem:[#allocation7 + $0x88] sm:$0xff] %v1253_v31  ;;  %v616_v26 = vadd.f32 1.0, %v584_v7  ;;  %v571_v15 = vmul.f32 0.3275911, %v539_v8  ;;  %vm472_vm10 = vcmp.ge.f32.partialorder %v1989_v60, 0.0  ;;  %v2049_v29 = vmul.f32 0.5, %v1969_v45 }
 0x161   :  { %v2038_v39 = vpop.eup %1561  ;;  %v890_v44 = vmul.f32 %v1997_v30, %v1381_v59  ;;  %v555_v20 = vand.u32 2147483647, %v2036_v9  ;;  %v1016_v21 = vmul.f32 %v984_v55, %v536_v53  ;;  %v2054_v2 = vsel %vm490_vm9, 1.0, %v2547_v12 }
 0x162   :  { %v714_v52 = vmul.f32 1.0614054, %v2038_v39  ;;  %1567 = vrcp.f32 %v616_v26  ;;  %v603_v27 = vadd.f32 1.0, %v571_v15  ;;  %v1000_v49 = vsub.f32 0.0, %v552_v4 }
 0x163   :  { %v922_v3 = vadd.f32 0.2548296, %v890_v44  ;;  %1569 = vpow2.f32 %v1088_v17  ;;  %v2059_v60 = vsel %vm472_vm10, 1.0, %v2547_v12  ;;  %v587_v58 = vmul.f32 0.3275911, %v555_v20 }
 0x164   :  { %v1365_v5 = vadd.f32 -1.4531521, %v714_v52  ;;  %v2056_v41 = vpop.eup %1563  ;;  %v2062_v45 = vmul.f32 0.70710677, %v2042_v19  ;;  %1571 = vrcp.f32 %v603_v27  ;;  %v1052_v48 = vmul.f32 1.442695, %v1016_v21 }
 0x165   :  { %v954_v53 = vmul.f32 %v1997_v30, %v922_v3  ;;  %v696_v47 = vmul.f32 1.0614054, %v2056_v41  ;;  %v1566_v13 = vpop.eup %1565  ;;  %v2067_v25 = vmul.f32 0.5, %v358_v34  ;;  %v987_v33 = vsub.f32 0.0, %v539_v8 }
 0x166   :  { %v778_v38 = vmul.f32 %v2038_v39, %v1365_v5  ;;  %v619_v50 = vadd.f32 1.0, %v587_v58  ;;  %v1032_v16 = vmul.f32 %v1000_v49, %v552_v4  ;;  %v1003_v11 = vsub.f32 0.0, %v555_v20 }
 0x167   :  { %v1114_v32 = vmul.f32 %v1566_v13, %v954_v53  ;;  %v1347_v51 = vadd.f32 -1.4531521, %v696_v47  ;;  %v2070_v1 = vand.u32 2147483647, %v2062_v45  ;;  %v2074_v30 = vadd.f32 %v1783_v24, %v1821_v6 }
 0x168   :  { %v810_v37 = vadd.f32 1.4214138, %v778_v38  ;;  %1573 = vrcp.f32 %v619_v50  ;;  %v2079_v54 = vmul.f32 0.5, %v2010_v40  ;;  %v1019_v56 = vmul.f32 %v987_v33, %v539_v8 }
 0x169   :  { %v1146_v43 = vsub.f32 1.0, %v1114_v32  ;;  %v760_v34 = vmul.f32 %v2056_v41, %v1347_v51  ;;  %1575 = vpow2.f32 %v1052_v48  ;;  %v569_v4 = vmul.f32 0.3275911, %v2070_v1 }
 0x16a   :  { %v842_v57 = vmul.f32 %v2038_v39, %v810_v37  ;;  %v2084_v31 = vadd.f32 %v1839_v18, %v1783_v24  ;;  %v2087_v7 = vmul.f32 0.70710677, %v2074_v30  ;;  %vm488_vm11 = vcmp.ge.f32.partialorder %v2015_v14, 0.0 }
 0x16b   :  { %v1178_v10 = vmul.f32 %v1146_v43, %v506_v35  ;;  %v792_v6 = vadd.f32 1.4214138, %v760_v34  ;;  %v1084_v40 = vmul.f32 1.442695, %v1032_v16  ;;  %v1035_v17 = vmul.f32 %v1003_v11, %v555_v20 }
 0x16c   :  { %v1397_v55 = vadd.f32 -0.28449672, %v842_v57  ;;  %v2089_v59 = vpop.eup %1567  ;;  %v601_v26 = vadd.f32 1.0, %v569_v4  ;;  %v1058_v52 = vmul.f32 1.442695, %v1019_v56  ;;  %v2105_v53 = vsel %vm488_vm11, 1.0, %v2547_v12 }
 0x16d   :  { %v1210_v8 = vadd.f32 1.0, %v1178_v10  ;;  %v824_v44 = vmul.f32 %v2056_v41, %v792_v6  ;;  %v712_v18 = vmul.f32 1.0614054, %v2089_v59  ;;  %v1570_v35 = vpop.eup %1569  ;;  %v553_v21 = vand.u32 2147483647, %v2087_v7 }
 0x16e   :  { %v906_v15 = vmul.f32 %v2038_v39, %v1397_v55  ;;  %1577 = vrcp.f32 %v601_v26  ;;  %v2097_v27 = vmul.f32 0.70710677, %v2084_v31  ;;  %v2099_v3 = vpop.eup %1571  ;;  %vm475_vm12 = vcmp.ge.f32.partialorder %v2018_v46, 0.0 }
 0x16f   :  { %v1242_v20 = vmul.f32 %v1210_v8, %v2026_v63  ;;  %v1379_v49 = vadd.f32 -0.28449672, %v824_v44  ;;  %v1363_v58 = vadd.f32 -1.4531521, %v712_v18  ;;  %1579 = vpow2.f32 %v1084_v40 }
 0x170   :  { %v938_v5 = vadd.f32 0.2548296, %v906_v15  ;;  %v699_v38 = vmul.f32 1.0614054, %v2099_v3  ;;  %v585_v47 = vmul.f32 0.3275911, %v553_v21  ;;  %1581 = vpow2.f32 %v1058_v52 }
 0x171   :  { %1274 = vst [vmem:[#allocation7 + $0x30] sm:$0xff] %v1242_v20  ;;  %v888_v48 = vmul.f32 %v2056_v41, %v1379_v49  ;;  %v776_v33 = vmul.f32 %v2089_v59, %v1363_v58  ;;  %v1090_v63 = vmul.f32 1.442695, %v1035_v17  ;;  %v2114_v14 = vand.u32 2147483647, %v2097_v27 }
 0x172   :  { %v970_v13 = vmul.f32 %v2038_v39, %v938_v5  ;;  %v2111_v50 = vpop.eup %1573  ;;  %v1350_v32 = vadd.f32 -1.4531521, %v699_v38  ;;  %v617_v37 = vadd.f32 1.0, %v585_v47  ;;  %v985_v34 = vsub.f32 0.0, %v2070_v1 }
 0x173   :  { %v920_v16 = vadd.f32 0.2548296, %v888_v48  ;;  %v808_v11 = vadd.f32 1.4214138, %v776_v33  ;;  %v715_v43 = vmul.f32 1.0614054, %v2111_v50  ;;  %v1576_v57 = vpop.eup %1575  ;;  %v2131_v20 = vadd.f32 %v1841_v22, %v1783_v24 }
 0x174   :  { %v1130_v51 = vmul.f32 %v1570_v35, %v970_v13  ;;  %v763_v39 = vmul.f32 %v2099_v3, %v1350_v32  ;;  %1583 = vrcp.f32 %v617_v37  ;;  %v1001_v40 = vsub.f32 0.0, %v553_v21 }
 0x175   :  { %v952_v4 = vmul.f32 %v2056_v41, %v920_v16  ;;  %v840_v10 = vmul.f32 %v2089_v59, %v808_v11  ;;  %v1366_v55 = vadd.f32 -1.4531521, %v715_v43  ;;  %1585 = vpow2.f32 %v1090_v63 }
 0x176   :  { %v1162_v56 = vsub.f32 1.0, %v1130_v51  ;;  %v795_v6 = vadd.f32 1.4214138, %v763_v39  ;;  %v574_v17 = vmul.f32 0.3275911, %v2114_v14  ;;  %v1017_v41 = vmul.f32 %v985_v34, %v2070_v1 }
 0x177   :  { %v1112_v8 = vmul.f32 %v1576_v57, %v952_v4  ;;  %v1395_v15 = vadd.f32 -0.28449672, %v840_v10  ;;  %v779_v44 = vmul.f32 %v2111_v50, %v1366_v55  ;;  %v1033_v48 = vmul.f32 %v1001_v40, %v553_v21 }
 0x178   :  { %v1194_v26 = vmul.f32 %v1162_v56, %v2054_v2  ;;  %v2125_v18 = vpop.eup %1577  ;;  %v827_v35 = vmul.f32 %v2099_v3, %v795_v6  ;;  %v606_v52 = vadd.f32 1.0, %v574_v17  ;;  %v507_v37 = vsel %vm475_vm12, 1.0, %v2547_v12 }
 0x179   :  { %v1144_v49 = vsub.f32 1.0, %v1112_v8  ;;  %v904_v58 = vmul.f32 %v2089_v59, %v1395_v15  ;;  %v811_v2 = vadd.f32 1.4214138, %v779_v44  ;;  %v1580_v38 = vpop.eup %1579  ;;  %v697_v13 = vmul.f32 1.0614054, %v2125_v18 }
 0x17a   :  { %v1226_v5 = vadd.f32 1.0, %v1194_v26  ;;  %v1382_v47 = vadd.f32 -0.28449672, %v827_v35  ;;  %1587 = vrcp.f32 %v606_v52  ;;  %v1582_v22 = vpop.eup %1581  ;;  %v1054_v11 = vmul.f32 1.442695, %v1017_v41 }
 0x17b   :  { %v1176_v1 = vmul.f32 %v1144_v49, %v2059_v60  ;;  %v936_v63 = vadd.f32 0.2548296, %v904_v58  ;;  %v843_v32 = vmul.f32 %v2111_v50, %v811_v2  ;;  %v1348_v16 = vadd.f32 -1.4531521, %v697_v13 }
 0x17c   :  { %v1258_v33 = vmul.f32 %v1226_v5, %v2032_v62  ;;  %v891_v51 = vmul.f32 %v2099_v3, %v1382_v47  ;;  %v2144_v62 = vmul.f32 0.70710677, %v2131_v20  ;;  %v1086_v56 = vmul.f32 1.442695, %v1033_v48 }
 0x17d   :  { %v1208_v43 = vadd.f32 1.0, %v1176_v1  ;;  %v968_v21 = vmul.f32 %v2089_v59, %v936_v63  ;;  %v1398_v57 = vadd.f32 -0.28449672, %v843_v32  ;;  %v761_v34 = vmul.f32 %v2125_v18, %v1348_v16 }
 0x17e   :  { %1290 = vst [vmem:[#allocation7 + $0xb0] sm:$0xff] %v1258_v33  ;;  %v2146_v60 = vpop.eup %1583  ;;  %v923_v39 = vadd.f32 0.2548296, %v891_v51  ;;  %v990_v46 = vsub.f32 0.0, %v2114_v14  ;;  %vm491_vm13 = vcmp.ge.f32.partialorder %v2036_v9, 0.0  ;;  %1589 = vpow2.f32 %v1054_v11 }
 0x17f   :  { %v1240_v4 = vmul.f32 %v1208_v43, %v2049_v29  ;;  %v1128_v10 = vmul.f32 %v1580_v38, %v968_v21  ;;  %v907_v55 = vmul.f32 %v2111_v50, %v1398_v57  ;;  %v713_v6 = vmul.f32 1.0614054, %v2146_v60  ;;  %v1586_v59 = vpop.eup %1585 }
 0x180   :  { %v955_v40 = vmul.f32 %v2099_v3, %v923_v39  ;;  %v793_v17 = vadd.f32 1.4214138, %v761_v34  ;;  %v2156_v26 = vand.u32 2147483647, %v2144_v62  ;;  %v1022_v41 = vmul.f32 %v990_v46, %v2114_v14 }
 0x181   :  { %1272 = vst [vmem:[#allocation7 + $0x20] sm:$0xff] %v1240_v4  ;;  %v1160_v8 = vsub.f32 1.0, %v1128_v10  ;;  %v939_v15 = vadd.f32 0.2548296, %v907_v55  ;;  %v1364_v44 = vadd.f32 -1.4531521, %v713_v6  ;;  %1591 = vpow2.f32 %v1086_v56 }
 0x182   :  { %v1115_v29 = vmul.f32 %v1582_v22, %v955_v40  ;;  %v825_v35 = vmul.f32 %v2125_v18, %v793_v17  ;;  %v590_v52 = vmul.f32 0.3275911, %v2156_v26  ;;  %v2168_v13 = vadd.f32 %v1783_v24, %v1843_v23 }
 0x183   :  { %v1192_v3 = vmul.f32 %v1160_v8, %v2105_v53  ;;  %v971_v5 = vmul.f32 %v2111_v50, %v939_v15  ;;  %v777_v49 = vmul.f32 %v2146_v60, %v1364_v44  ;;  %v1064_v63 = vmul.f32 1.442695, %v1022_v41 }
 0x184   :  { %v2164_v58 = vpop.eup %1587  ;;  %v1147_v2 = vsub.f32 1.0, %v1115_v29  ;;  %v1380_v38 = vadd.f32 -0.28449672, %v825_v35  ;;  %v622_v47 = vadd.f32 1.0, %v590_v52  ;;  %v523_v23 = vsel %vm491_vm13, 1.0, %v2547_v12 }
 0x185   :  { %v1224_v48 = vadd.f32 1.0, %v1192_v3  ;;  %v1131_v14 = vmul.f32 %v1586_v59, %v971_v5  ;;  %v809_v33 = vadd.f32 1.4214138, %v777_v49  ;;  %v702_v1 = vmul.f32 1.0614054, %v2164_v58  ;;  %v2548_v49 = vld [vmem:[#allocation11_spill] sm:$0xff] }
 0x186   :  { %v1179_v53 = vmul.f32 %v1147_v2, %v507_v37  ;;  %v889_v50 = vmul.f32 %v2125_v18, %v1380_v38  ;;  %1593 = vrcp.f32 %v622_v47  ;;  %v2178_v21 = vmul.f32 0.70710677, %v2168_v13  ;;  %v2209_v5 = vld [vmem:[%s2534_s2] ss:$0 sm:$0xff]  ;;  %s1733_s2 = smov [#allocation7]  }
 0x187   :  { %v1256_v32 = vmul.f32 %v1224_v48, %v2067_v25  ;;  %v1163_v22 = vsub.f32 1.0, %v1131_v14  ;;  %v841_v51 = vmul.f32 %v2146_v60, %v809_v33  ;;  %v1353_v16 = vadd.f32 -1.4531521, %v702_v1  ;;  %s1305_s13 = sshll.u32 %s1733_s2, 4  ;;  %s1306_s13 = int_to_ptr.vmem [resolvable:$true] %s1305_s13 }
 0x188   :  { %v1211_v11 = vadd.f32 1.0, %v1179_v53  ;;  %v921_v43 = vadd.f32 0.2548296, %v889_v50  ;;  %v2183_v25 = vadd.f32 %v1783_v24, %v1852_v28  ;;  %v427_v56 = vmul.f32 0.5, %v2022_v61  ;;  %v1590_v4 = vpop.eup %1589  ;;  %s1700_s14 = scalar_lea.vmem %s1306_s13, 4096  ;;  %p1705_p3 = scmp.lt.s32.totalorder %s1306_s13, %s1306_s13 }
 0x189   :  { %1288 = vst [vmem:[#allocation7 + $0xa0] sm:$0xff] %v1256_v32  ;;  %v1195_v37 = vmul.f32 %v1163_v22, %v523_v23  ;;  %v1396_v57 = vadd.f32 -0.28449672, %v841_v51  ;;  %v766_v39 = vmul.f32 %v2164_v58, %v1353_v16  ;;  %v2189_v46 = vand.u32 2147483647, %v2178_v21  ;;  %v2549_v16 = vld [vmem:[#allocation12_spill] sm:$0xff]  ;;  %p1701_p2 = scmp.ne.s32.totalorder %s1306_s13, %s1700_s14  ;;  %p1706_p4 = scmp.lt.s32.totalorder %s1700_s14, %s1700_s14 }
 0x18a   :  { %v1243_v34 = vmul.f32 %v1211_v11, %v2079_v54  ;;  %v953_v9 = vmul.f32 %v2125_v18, %v921_v43  ;;  %vm473_vm14 = vcmp.ge.f32.partialorder %v2062_v45, 0.0  ;;  %1595 = vpow2.f32 %v1064_v63 }
 0x18b   :  { %v1227_v10 = vadd.f32 1.0, %v1195_v37  ;;  %v905_v55 = vmul.f32 %v2146_v60, %v1396_v57  ;;  %v798_v6 = vadd.f32 1.4214138, %v766_v39  ;;  %v1006_v24 = vsub.f32 0.0, %v2156_v26  ;;  %v1592_v61 = vpop.eup %1591  ;;  %p1707_p5 = por %p1706_p4, %p1705_p3 }
 0x18c   :  { %1275 = vst [vmem:[#allocation7 + $0x38] sm:$0xff] %v1243_v34  ;;  %v1113_v59 = vmul.f32 %v1590_v4, %v953_v9  ;;  %v572_v28 = vmul.f32 0.3275911, %v2189_v46  ;;  %v2197_v17 = vmul.f32 0.70710677, %v2183_v25  ;;  %v505_v45 = vsel %vm473_vm14, 1.0, %v2547_v12 }
 0x18d   :  { %v1259_v54 = vmul.f32 %v1227_v10, %v427_v56  ;;  %v937_v18 = vadd.f32 0.2548296, %v905_v55  ;;  %v830_v40 = vmul.f32 %v2164_v58, %v798_v6  ;;  %vm489_vm15 = vcmp.ge.f32.partialorder %v2087_v7, 0.0  ;;  %p1708_p6 = pnand %p1707_p5, %p1701_p2 }
 0x18e   :  { %v1145_v8 = vsub.f32 1.0, %v1113_v59  ;;  %v604_v15 = vadd.f32 1.0, %v572_v28  ;;  %v556_v35 = vand.u32 2147483647, %v2197_v17  ;;  %v1038_v3 = vmul.f32 %v1006_v24, %v2156_v26 }
 0x18f   :  { %1291 = vst [vmem:[#allocation7 + $0xb8] sm:$0xff] %v1259_v54  ;;  %v969_v44 = vmul.f32 %v2146_v60, %v937_v18  ;;  %v1385_v29 = vadd.f32 -0.28449672, %v830_v40  ;;  %v2213_v2 = vadd.f32 %v2209_v5, %v2548_v49  ;;  %v409_v14 = vmul.f32 0.5, %v2042_v19  ;;  %v2550_v54 = vld [vmem:[#allocation13_spill] sm:$0xff] }
 0x190   :  { %v2203_v41 = vpop.eup %1593  ;;  %v1177_v52 = vmul.f32 %v1145_v8, %v505_v45  ;;  %1597 = vrcp.f32 %v604_v15  ;;  %v588_v48 = vmul.f32 0.3275911, %v556_v35  ;;  %v521_v26 = vsel %vm489_vm15, 1.0, %v2547_v12 }
 0x191   :  { %v1129_v38 = vmul.f32 %v1592_v61, %v969_v44  ;;  %v894_v60 = vmul.f32 %v2164_v58, %v1385_v29  ;;  %v718_v47 = vmul.f32 1.0614054, %v2203_v41  ;;  %vm478_vm0 = vcmp.ge.f32.partialorder %v2097_v27, 0.0 }
 0x192   :  { %v1209_v33 = vadd.f32 1.0, %v1177_v52  ;;  %v620_v63 = vadd.f32 1.0, %v588_v48  ;;  %v1096_v22 = vmul.f32 1.442695, %v1038_v3  ;;  %v2223_v51 = vmul.f32 0.70710677, %v2213_v2 }
 0x193   :  { %v1161_v1 = vsub.f32 1.0, %v1129_v38  ;;  %v926_v53 = vadd.f32 0.2548296, %v894_v60  ;;  %v1369_v50 = vadd.f32 -1.4531521, %v718_v47  ;;  %v2227_v11 = vadd.f32 %v2209_v5, %v2549_v16 }
 0x194   :  { %v1241_v32 = vmul.f32 %v1209_v33, %v409_v14  ;;  %1599 = vrcp.f32 %v620_v63  ;;  %v1596_v43 = vpop.eup %1595  ;;  %v425_v37 = vmul.f32 0.5, %v2074_v30  ;;  %v988_v57 = vsub.f32 0.0, %v2189_v46 }
 0x195   :  { %v1193_v19 = vmul.f32 %v1161_v1, %v521_v26  ;;  %v958_v23 = vmul.f32 %v2164_v58, %v926_v53  ;;  %v782_v7 = vmul.f32 %v2203_v41, %v1369_v50  ;;  %v543_v39 = vand.u32 2147483647, %v2223_v51  ;;  %v2551_v26 = vld [vmem:[#allocation14_spill] sm:$0xff] }
 0x196   :  { %1273 = vst [vmem:[#allocation7 + $0x28] sm:$0xff] %v1241_v32  ;;  %v510_v56 = vsel %vm478_vm0, 1.0, %v2547_v12  ;;  %vm494_vm1 = vcmp.ge.f32.partialorder %v2144_v62, 0.0  ;;  %1601 = vpow2.f32 %v1096_v22  ;;  %v2239_v10 = vmul.f32 0.70710677, %v2227_v11 }
 0x197   :  { %v1225_v34 = vadd.f32 1.0, %v1193_v19  ;;  %v1118_v9 = vmul.f32 %v1596_v43, %v958_v23  ;;  %v814_v4 = vadd.f32 1.4214138, %v782_v7  ;;  %v575_v58 = vmul.f32 0.3275911, %v543_v39 }
 0x198   :  { %v1004_v59 = vsub.f32 0.0, %v556_v35  ;;  %v1020_v28 = vmul.f32 %v988_v57, %v2189_v46  ;;  %v559_v61 = vand.u32 2147483647, %v2239_v10  ;;  %v2248_v18 = vadd.f32 %v2209_v5, %v2550_v54 }
 0x199   :  { %v1257_v55 = vmul.f32 %v1225_v34, %v425_v37  ;;  %v1150_v30 = vsub.f32 1.0, %v1118_v9  ;;  %v846_v6 = vmul.f32 %v2203_v41, %v814_v4  ;;  %v607_v27 = vadd.f32 1.0, %v575_v58 }
 0x19a   :  { %v2242_v24 = vpop.eup %1597  ;;  %v414_v40 = vmul.f32 0.5, %v2084_v31  ;;  %v2253_v44 = vmul.f32 0.5, %v2131_v20  ;;  %v526_v46 = vsel %vm494_vm1, 1.0, %v2547_v12  ;;  %v591_v29 = vmul.f32 0.3275911, %v559_v61 }
 0x19b   :  { %1289 = vst [vmem:[#allocation7 + $0xa8] sm:$0xff] %v1257_v55  ;;  %v1182_v45 = vmul.f32 %v1150_v30, %v510_v56  ;;  %v1401_v8 = vadd.f32 -0.28449672, %v846_v6  ;;  %v700_v15 = vmul.f32 1.0614054, %v2242_v24  ;;  %1603 = vrcp.f32 %v607_v27 }
 0x19c   :  { %v1036_v38 = vmul.f32 %v1004_v59, %v556_v35  ;;  %v2260_v31 = vmul.f32 0.5, %v2168_v13  ;;  %v1060_v60 = vmul.f32 1.442695, %v1020_v28  ;;  %v623_v47 = vadd.f32 1.0, %v591_v29  ;;  %v2552_v59 = vld [vmem:[#allocation15_spill] sm:$0xff] }
 0x19d   :  { %v1214_v52 = vadd.f32 1.0, %v1182_v45  ;;  %v910_v3 = vmul.f32 %v2203_v41, %v1401_v8  ;;  %v1351_v49 = vadd.f32 -1.4531521, %v700_v15  ;;  %v2263_v48 = vmul.f32 0.70710677, %v2248_v18 }
 0x19e   :  { %v2265_v20 = vpop.eup %1599  ;;  %v2270_v1 = vadd.f32 %v2209_v5, %v2551_v26  ;;  %vm476_vm2 = vcmp.ge.f32.partialorder %v2178_v21, 0.0  ;;  %v991_v35 = vsub.f32 0.0, %v543_v39  ;;  %1605 = vrcp.f32 %v623_v47 }
 0x19f   :  { %v1246_v14 = vmul.f32 %v1214_v52, %v414_v40  ;;  %v942_v62 = vadd.f32 0.2548296, %v910_v3  ;;  %v764_v33 = vmul.f32 %v2242_v24, %v1351_v49  ;;  %v716_v13 = vmul.f32 1.0614054, %v2265_v20 }
 0x1a0   :  { %v1092_v63 = vmul.f32 1.442695, %v1036_v38  ;;  %v2276_v32 = vand.u32 2147483647, %v2263_v48  ;;  %v1602_v22 = vpop.eup %1601  ;;  %1607 = vpow2.f32 %v1060_v60  ;;  %v1007_v19 = vsub.f32 0.0, %v559_v61 }
 0x1a1   :  { %1278 = vst [vmem:[#allocation7 + $0x50] sm:$0xff] %v1246_v14  ;;  %v974_v53 = vmul.f32 %v2203_v41, %v942_v62  ;;  %v796_v50 = vadd.f32 1.4214138, %v764_v33  ;;  %v1367_v16 = vadd.f32 -1.4531521, %v716_v13  ;;  %v508_v7 = vsel %vm476_vm2, 1.0, %v2547_v12 }
 0x1a2   :  { %v2279_v23 = vmul.f32 0.70710677, %v2270_v1  ;;  %v573_v37 = vmul.f32 0.3275911, %v2276_v32  ;;  %vm492_vm3 = vcmp.ge.f32.partialorder %v2197_v17, 0.0  ;;  %v1023_v57 = vmul.f32 %v991_v35, %v543_v39 }
 0x1a3   :  { %v1134_v21 = vmul.f32 %v1602_v22, %v974_v53  ;;  %v828_v43 = vmul.f32 %v2242_v24, %v796_v50  ;;  %v780_v41 = vmul.f32 %v2265_v20, %v1367_v16  ;;  %1609 = vpow2.f32 %v1092_v63 }
 0x1a4   :  { %v2287_v34 = vand.u32 2147483647, %v2279_v23  ;;  %v605_v4 = vadd.f32 1.0, %v573_v37  ;;  %v1039_v30 = vmul.f32 %v1007_v19, %v559_v61  ;;  %v2294_v28 = vadd.f32 %v2209_v5, %v2552_v59 }
 0x1a5   :  { %v1166_v56 = vsub.f32 1.0, %v1134_v21  ;;  %v1383_v9 = vadd.f32 -0.28449672, %v828_v43  ;;  %v2289_v58 = vpop.eup %1603  ;;  %v812_v55 = vadd.f32 1.4214138, %v780_v41  ;;  %v2299_v40 = vmul.f32 0.5, %v2183_v25 }
 0x1a6   :  { %v589_v6 = vmul.f32 0.3275911, %v2287_v34  ;;  %v703_v54 = vmul.f32 1.0614054, %v2289_v58  ;;  %1611 = vrcp.f32 %v605_v4  ;;  %v1066_v8 = vmul.f32 1.442695, %v1023_v57 }
 0x1a7   :  { %v1198_v27 = vmul.f32 %v1166_v56, %v526_v46  ;;  %v892_v39 = vmul.f32 %v2242_v24, %v1383_v9  ;;  %v844_v45 = vmul.f32 %v2265_v20, %v812_v55  ;;  %v524_v52 = vsel %vm492_vm3, 1.0, %v2547_v12  ;;  %v2553_v43 = vld [vmem:[#allocation16_spill] sm:$0xff] }
 0x1a8   :  { %v621_v15 = vadd.f32 1.0, %v589_v6  ;;  %v1354_v3 = vadd.f32 -1.4531521, %v703_v54  ;;  %v2305_v46 = vpop.eup %1605  ;;  %v1098_v38 = vmul.f32 1.442695, %v1039_v30  ;;  %v989_v26 = vsub.f32 0.0, %v2276_v32 }
 0x1a9   :  { %v1230_v61 = vadd.f32 1.0, %v1198_v27  ;;  %v924_v29 = vadd.f32 0.2548296, %v892_v39  ;;  %v1399_v49 = vadd.f32 -0.28449672, %v844_v45  ;;  %v2320_v53 = vmul.f32 0.5, %v2213_v2 }
 0x1aa   :  { %v2308_v60 = vmul.f32 0.70710677, %v2294_v28  ;;  %v767_v14 = vmul.f32 %v2289_v58, %v1354_v3  ;;  %v719_v62 = vmul.f32 1.0614054, %v2305_v46  ;;  %v1608_v33 = vpop.eup %1607  ;;  %1613 = vrcp.f32 %v621_v15  ;;  %v2554_v27 = vld [vmem:[#allocation17_spill] sm:$0xff] }
 0x1ab   :  { %v1262_v25 = vmul.f32 %v1230_v61, %v2253_v44  ;;  %v956_v47 = vmul.f32 %v2242_v24, %v924_v29  ;;  %v908_v17 = vmul.f32 %v2265_v20, %v1399_v49  ;;  %vm479_vm4 = vcmp.ge.f32.partialorder %v2223_v51, 0.0 }
 0x1ac   :  { %v2317_v13 = vand.u32 2147483647, %v2308_v60  ;;  %v799_v44 = vadd.f32 1.4214138, %v767_v14  ;;  %v1370_v24 = vadd.f32 -1.4531521, %v719_v62  ;;  %1615 = vpow2.f32 %v1066_v8 }
 0x1ad   :  { %1294 = vst [vmem:[#allocation7 + $0xd0] sm:$0xff] %v1262_v25  ;;  %v1116_v35 = vmul.f32 %v1608_v33, %v956_v47  ;;  %v940_v50 = vadd.f32 0.2548296, %v908_v17  ;;  %v1610_v22 = vpop.eup %1609  ;;  %v2328_v37 = vadd.f32 %v2209_v5, %v2553_v43  ;;  %1617 = vpow2.f32 %v1098_v38 }
 0x1ae   :  { %v578_v63 = vmul.f32 0.3275911, %v2317_v13  ;;  %v831_v19 = vmul.f32 %v2289_v58, %v799_v44  ;;  %v783_v21 = vmul.f32 %v2305_v46, %v1370_v24  ;;  %v1021_v41 = vmul.f32 %v989_v26, %v2276_v32 }
 0x1af   :  { %v1148_v16 = vsub.f32 1.0, %v1116_v35  ;;  %v972_v2 = vmul.f32 %v2265_v20, %v940_v50  ;;  %v1005_v30 = vsub.f32 0.0, %v2287_v34  ;;  %v2338_v39 = vadd.f32 %v2209_v5, %v2554_v27 }
 0x1b0   :  { %v610_v57 = vadd.f32 1.0, %v578_v63  ;;  %v2332_v56 = vpop.eup %1611  ;;  %v1386_v4 = vadd.f32 -0.28449672, %v831_v19  ;;  %v815_v55 = vadd.f32 1.4214138, %v783_v21  ;;  %v511_v8 = vsel %vm479_vm4, 1.0, %v2547_v12 }
 0x1b1   :  { %v1180_v9 = vmul.f32 %v1148_v16, %v508_v7  ;;  %v1132_v6 = vmul.f32 %v1610_v22, %v972_v2  ;;  %v701_v59 = vmul.f32 1.0614054, %v2332_v56  ;;  %v2343_v45 = vmul.f32 0.70710677, %v2328_v37 }
 0x1b2   :  { %1619 = vrcp.f32 %v610_v57  ;;  %v895_v54 = vmul.f32 %v2289_v58, %v1386_v4  ;;  %v847_v32 = vmul.f32 %v2305_v46, %v815_v55  ;;  %v2349_v15 = vmul.f32 0.5, %v2227_v11 }
 0x1b3   :  { %v1212_v20 = vadd.f32 1.0, %v1180_v9  ;;  %v1164_v7 = vsub.f32 1.0, %v1132_v6  ;;  %v1352_v61 = vadd.f32 -1.4531521, %v701_v59  ;;  %v1062_v38 = vmul.f32 1.442695, %v1021_v41 }
 0x1b4   :  { %v927_v3 = vadd.f32 0.2548296, %v895_v54  ;;  %v1402_v49 = vadd.f32 -0.28449672, %v847_v32  ;;  %v2352_v25 = vpop.eup %1613  ;;  %v1037_v62 = vmul.f32 %v1005_v30, %v2287_v34  ;;  %v2357_v33 = vand.u32 2147483647, %v2343_v45 }
 0x1b5   :  { %v1244_v29 = vmul.f32 %v1212_v20, %v2260_v31  ;;  %v1196_v47 = vmul.f32 %v1164_v7, %v524_v52  ;;  %v765_v14 = vmul.f32 %v2332_v56, %v1352_v61  ;;  %v717_v31 = vmul.f32 1.0614054, %v2352_v25 }
 0x1b6   :  { %v959_v51 = vmul.f32 %v2289_v58, %v927_v3  ;;  %v911_v11 = vmul.f32 %v2305_v46, %v1402_v49  ;;  %v2363_v17 = vmul.f32 0.70710677, %v2338_v39  ;;  %v1616_v26 = vpop.eup %1615  ;;  %v994_v44 = vsub.f32 0.0, %v2317_v13 }
 0x1b7   :  { %1276 = vst [vmem:[#allocation7 + $0x40] sm:$0xff] %v1244_v29  ;;  %v1228_v35 = vadd.f32 1.0, %v1196_v47  ;;  %v797_v52 = vadd.f32 1.4214138, %v765_v14  ;;  %v594_v34 = vmul.f32 0.3275911, %v2357_v33  ;;  %1621 = vpow2.f32 %v1062_v38  ;;  %v1618_v22 = vpop.eup %1617 }
 0x1b8   :  { %v1119_v24 = vmul.f32 %v1616_v26, %v959_v51  ;;  %v943_v50 = vadd.f32 0.2548296, %v911_v11  ;;  %v1368_v63 = vadd.f32 -1.4531521, %v717_v31  ;;  %v1094_v19 = vmul.f32 1.442695, %v1037_v62 }
 0x1b9   :  { %v1260_v58 = vmul.f32 %v1228_v35, %v2299_v40  ;;  %v829_v16 = vmul.f32 %v2332_v56, %v797_v52  ;;  %v626_v21 = vadd.f32 1.0, %v594_v34  ;;  %vm495_vm5 = vcmp.ge.f32.partialorder %v2239_v10, 0.0  ;;  %v2556_v34 = vld [vmem:[#allocation19_spill] sm:$0xff] }
 0x1ba   :  { %v1151_v43 = vsub.f32 1.0, %v1119_v24  ;;  %v975_v2 = vmul.f32 %v2305_v46, %v943_v50  ;;  %v781_v41 = vmul.f32 %v2352_v25, %v1368_v63  ;;  %v1026_v4 = vmul.f32 %v994_v44, %v2317_v13 }
 0x1bb   :  { %1292 = vst [vmem:[#allocation7 + $0xc0] sm:$0xff] %v1260_v58  ;;  %v1384_v9 = vadd.f32 -0.28449672, %v829_v16  ;;  %1623 = vrcp.f32 %v626_v21  ;;  %v2376_v40 = vand.u32 2147483647, %v2363_v17  ;;  %v527_v10 = vsel %vm495_vm5, 1.0, %v2547_v12 }
 0x1bc   :  { %v2372_v57 = vpop.eup %1619  ;;  %v1183_v55 = vmul.f32 %v1151_v43, %v511_v8  ;;  %v1135_v30 = vmul.f32 %v1618_v22, %v975_v2  ;;  %v813_v6 = vadd.f32 1.4214138, %v781_v41  ;;  %1625 = vpow2.f32 %v1094_v19  ;;  %v2555_v8 = vld [vmem:[#allocation18_spill] sm:$0xff] }
 0x1bd   :  { %v706_v59 = vmul.f32 1.0614054, %v2372_v57  ;;  %v893_v46 = vmul.f32 %v2332_v56, %v1384_v9  ;;  %v576_v27 = vmul.f32 0.3275911, %v2376_v40  ;;  %v1072_v61 = vmul.f32 1.442695, %v1026_v4 }
 0x1be   :  { %v1215_v20 = vadd.f32 1.0, %v1183_v55  ;;  %v1167_v54 = vsub.f32 1.0, %v1135_v30  ;;  %v845_v13 = vmul.f32 %v2352_v25, %v813_v6  ;;  %v2385_v3 = vadd.f32 %v2209_v5, %v2555_v8 }
 0x1bf   :  { %v1357_v32 = vadd.f32 -1.4531521, %v706_v59  ;;  %v925_v7 = vadd.f32 0.2548296, %v893_v46  ;;  %v608_v29 = vadd.f32 1.0, %v576_v27  ;;  %vm477_vm6 = vcmp.ge.f32.partialorder %v2263_v48, 0.0 }
 0x1c0   :  { %v1247_v49 = vmul.f32 %v1215_v20, %v2320_v53  ;;  %v1199_v38 = vmul.f32 %v1167_v54, %v527_v10  ;;  %v1400_v47 = vadd.f32 -0.28449672, %v845_v13  ;;  %v1010_v51 = vsub.f32 0.0, %v2357_v33 }
 0x1c1   :  { %v770_v14 = vmul.f32 %v2372_v57, %v1357_v32  ;;  %v957_v62 = vmul.f32 %v2332_v56, %v925_v7  ;;  %1627 = vrcp.f32 %v608_v29  ;;  %v1622_v11 = vpop.eup %1621  ;;  %v2394_v52 = vmul.f32 0.70710677, %v2385_v3 }
 0x1c2   :  { %1279 = vst [vmem:[#allocation7 + $0x58] sm:$0xff] %v1247_v49  ;;  %v1231_v31 = vadd.f32 1.0, %v1199_v38  ;;  %v909_v26 = vmul.f32 %v2352_v25, %v1400_v47  ;;  %v413_v53 = vmul.f32 0.5, %v2248_v18  ;;  %1629 = vpow2.f32 %v1072_v61 }
 0x1c3   :  { %v802_v35 = vadd.f32 1.4214138, %v770_v14  ;;  %v1117_v44 = vmul.f32 %v1622_v11, %v957_v62  ;;  %v2399_v48 = vadd.f32 %v2209_v5, %v2556_v34  ;;  %v509_v24 = vsel %vm477_vm6, 1.0, %v2547_v12 }
 0x1c4   :  { %v1263_v56 = vmul.f32 %v1231_v31, %v2349_v15  ;;  %v941_v50 = vadd.f32 0.2548296, %v909_v26  ;;  %vm493_vm7 = vcmp.ge.f32.partialorder %v2279_v23, 0.0  ;;  %v1042_v18 = vmul.f32 %v1010_v51, %v2357_v33 }
 0x1c5   :  { %v834_v63 = vmul.f32 %v2372_v57, %v802_v35  ;;  %v2404_v22 = vpop.eup %1623  ;;  %v1149_v58 = vsub.f32 1.0, %v1117_v44  ;;  %v560_v16 = vand.u32 2147483647, %v2394_v52  ;;  %v2412_v43 = vmul.f32 0.70710677, %v2399_v48 }
 0x1c6   :  { %1295 = vst [vmem:[#allocation7 + $0xd8] sm:$0xff] %v1263_v56  ;;  %v973_v19 = vmul.f32 %v2352_v25, %v941_v50  ;;  %v722_v15 = vmul.f32 1.0614054, %v2404_v22  ;;  %v1626_v2 = vpop.eup %1625  ;;  %v992_v9 = vsub.f32 0.0, %v2376_v40  ;;  %v2417_v55 = vadd.f32 %v2209_v5, %v1955_v42 }
 0x1c7   :  { %v1389_v21 = vadd.f32 -0.28449672, %v834_v63  ;;  %v1181_v41 = vmul.f32 %v1149_v58, %v509_v24  ;;  %v592_v4 = vmul.f32 0.3275911, %v560_v16  ;;  %v429_v33 = vmul.f32 0.5, %v2270_v1 }
 0x1c8   :  { %v1133_v30 = vmul.f32 %v1626_v2, %v973_v19  ;;  %v1373_v6 = vadd.f32 -1.4531521, %v722_v15  ;;  %v525_v10 = vsel %vm493_vm7, 1.0, %v2547_v12  ;;  %v1104_v46 = vmul.f32 1.442695, %v1042_v18 }
 0x1c9   :  { %v898_v25 = vmul.f32 %v2372_v57, %v1389_v21  ;;  %v1213_v59 = vadd.f32 1.0, %v1181_v41  ;;  %v624_v27 = vadd.f32 1.0, %v592_v4  ;;  %v2426_v42 = vand.u32 2147483647, %v2412_v43 }
 0x1ca   :  { %v1165_v20 = vsub.f32 1.0, %v1133_v30  ;;  %v786_v13 = vmul.f32 %v2404_v22, %v1373_v6  ;;  %v1024_v7 = vmul.f32 %v992_v9, %v2376_v40  ;;  %v2432_v61 = vmul.f32 0.70710677, %v2417_v55 }
 0x1cb   :  { %v930_v54 = vadd.f32 0.2548296, %v898_v25  ;;  %v2428_v32 = vpop.eup %1627  ;;  %v1245_v1 = vmul.f32 %v1213_v59, %v413_v53  ;;  %1631 = vrcp.f32 %v624_v27  ;;  %vm482_vm8 = vcmp.ge.f32.partialorder %v2308_v60, 0.0 }
 0x1cc   :  { %v1197_v23 = vmul.f32 %v1165_v20, %v525_v10  ;;  %v818_v8 = vadd.f32 1.4214138, %v786_v13  ;;  %v704_v49 = vmul.f32 1.0614054, %v2428_v32  ;;  %v1630_v38 = vpop.eup %1629  ;;  %1633 = vpow2.f32 %v1104_v46 }
 0x1cd   :  { %v962_v29 = vmul.f32 %v2372_v57, %v930_v54  ;;  %1277 = vst [vmem:[#allocation7 + $0x48] sm:$0xff] %v1245_v1  ;;  %v1008_v47 = vsub.f32 0.0, %v560_v16  ;;  %v579_v14 = vmul.f32 0.3275911, %v2426_v42  ;;  %v1068_v31 = vmul.f32 1.442695, %v1024_v7 }
 0x1ce   :  { %v1229_v62 = vadd.f32 1.0, %v1197_v23  ;;  %v850_v51 = vmul.f32 %v2404_v22, %v818_v8  ;;  %v1355_v11 = vadd.f32 -1.4531521, %v704_v49  ;;  %v2440_v57 = vand.u32 2147483647, %v2432_v61 }
 0x1cf   :  { %v1122_v40 = vmul.f32 %v1630_v38, %v962_v29  ;;  %v611_v26 = vadd.f32 1.0, %v579_v14  ;;  %v514_v60 = vsel %vm482_vm8, 1.0, %v2547_v12  ;;  %v1040_v56 = vmul.f32 %v1008_v47, %v560_v16 }
 0x1d0   :  { %v1261_v35 = vmul.f32 %v1229_v62, %v429_v33  ;;  %v1405_v44 = vadd.f32 -0.28449672, %v850_v51  ;;  %v768_v34 = vmul.f32 %v2428_v32, %v1355_v11  ;;  %v595_v24 = vmul.f32 0.3275911, %v2440_v57 }
 0x1d1   :  { %v1154_v53 = vsub.f32 1.0, %v1122_v40  ;;  %1635 = vrcp.f32 %v611_v26  ;;  %v2448_v18 = vadd.f32 %v2209_v5, %v1974_v36  ;;  %v2452_v21 = vadd.f32 %v2209_v5, %v1995_v0 }
 0x1d2   :  { %1293 = vst [vmem:[#allocation7 + $0xc8] sm:$0xff] %v1261_v35  ;;  %v914_v63 = vmul.f32 %v2404_v22, %v1405_v44  ;;  %v800_v58 = vadd.f32 1.4214138, %v768_v34  ;;  %1637 = vpow2.f32 %v1068_v31  ;;  %v627_v19 = vadd.f32 1.0, %v595_v24 }
 0x1d3   :  { %v1186_v50 = vmul.f32 %v1154_v53, %v514_v60  ;;  %v418_v16 = vmul.f32 0.5, %v2294_v28  ;;  %vm498_vm9 = vcmp.ge.f32.partialorder %v2343_v45, 0.0  ;;  %v1100_v4 = vmul.f32 1.442695, %v1040_v56 }
 0x1d4   :  { %v946_v2 = vadd.f32 0.2548296, %v914_v63  ;;  %v832_v41 = vmul.f32 %v2428_v32, %v800_v58  ;;  %1639 = vrcp.f32 %v627_v19  ;;  %v2460_v36 = vmul.f32 0.70710677, %v2448_v18 }
 0x1d5   :  { %v1218_v15 = vadd.f32 1.0, %v1186_v50  ;;  %v2456_v9 = vpop.eup %1631  ;;  %v995_v25 = vsub.f32 0.0, %v2426_v42  ;;  %v2467_v59 = vmul.f32 0.70710677, %v2452_v21  ;;  %1641 = vpow2.f32 %v1100_v4 }
 0x1d6   :  { %v978_v30 = vmul.f32 %v2404_v22, %v946_v2  ;;  %v1387_v0 = vadd.f32 -0.28449672, %v832_v41  ;;  %v720_v5 = vmul.f32 1.0614054, %v2456_v9  ;;  %v1634_v28 = vpop.eup %1633  ;;  %v545_v6 = vand.u32 2147483647, %v2460_v36 }
 0x1d7   :  { %v1250_v33 = vmul.f32 %v1218_v15, %v418_v16  ;;  %v530_v22 = vsel %vm498_vm9, 1.0, %v2547_v12  ;;  %v2474_v54 = vand.u32 2147483647, %v2467_v59  ;;  %v1027_v29 = vmul.f32 %v995_v25, %v2426_v42 }
 0x1d8   :  { %v1138_v10 = vmul.f32 %v1634_v28, %v978_v30  ;;  %v896_v46 = vmul.f32 %v2428_v32, %v1387_v0  ;;  %v1371_v27 = vadd.f32 -1.4531521, %v720_v5  ;;  %v577_v20 = vmul.f32 0.3275911, %v545_v6 }
 0x1d9   :  { %1282 = vst [vmem:[#allocation7 + $0x70] sm:$0xff] %v1250_v33  ;;  %v1011_v8 = vsub.f32 0.0, %v2440_v57  ;;  %v593_v38 = vmul.f32 0.3275911, %v2474_v54  ;;  %v434_v51 = vmul.f32 0.5, %v2328_v37  ;;  %vm480_vm10 = vcmp.ge.f32.partialorder %v2363_v17, 0.0 }
 0x1da   :  { %v1170_v13 = vsub.f32 1.0, %v1138_v10  ;;  %v928_v1 = vadd.f32 0.2548296, %v896_v46  ;;  %v784_v7 = vmul.f32 %v2456_v9, %v1371_v27  ;;  %v609_v49 = vadd.f32 1.0, %v577_v20 }
 0x1db   :  { %v2477_v23 = vpop.eup %1635  ;;  %v625_v11 = vadd.f32 1.0, %v593_v38  ;;  %v1074_v44 = vmul.f32 1.442695, %v1027_v29  ;;  %v512_v37 = vsel %vm480_vm10, 1.0, %v2547_v12  ;;  %v416_v19 = vmul.f32 0.5, %v2338_v39 }
 0x1dc   :  { %v1202_v45 = vmul.f32 %v1170_v13, %v530_v22  ;;  %v960_v47 = vmul.f32 %v2428_v32, %v928_v1  ;;  %v816_v14 = vadd.f32 1.4214138, %v784_v7  ;;  %v707_v62 = vmul.f32 1.0614054, %v2477_v23  ;;  %v1638_v40 = vpop.eup %1637 }
 0x1dd   :  { %1643 = vrcp.f32 %v609_v49  ;;  %v1043_v32 = vmul.f32 %v1011_v8, %v2440_v57  ;;  %v993_v57 = vsub.f32 0.0, %v545_v6  ;;  %vm496_vm11 = vcmp.ge.f32.partialorder %v2394_v52, 0.0 }
 0x1de   :  { %v1234_v31 = vadd.f32 1.0, %v1202_v45  ;;  %v1120_v42 = vmul.f32 %v1638_v40, %v960_v47  ;;  %v848_v26 = vmul.f32 %v2456_v9, %v816_v14  ;;  %v1358_v35 = vadd.f32 -1.4531521, %v707_v62  ;;  %v2487_v53 = vpop.eup %1639 }
 0x1df   :  { %v723_v17 = vmul.f32 1.0614054, %v2487_v53  ;;  %1645 = vrcp.f32 %v625_v11  ;;  %v1642_v15 = vpop.eup %1641  ;;  %v1106_v33 = vmul.f32 1.442695, %v1043_v32  ;;  %v1025_v39 = vmul.f32 %v993_v57, %v545_v6 }
 0x1e0   :  { %v1266_v34 = vmul.f32 %v1234_v31, %v434_v51  ;;  %v1152_v60 = vsub.f32 1.0, %v1120_v42  ;;  %v1403_v56 = vadd.f32 -0.28449672, %v848_v26  ;;  %v771_v24 = vmul.f32 %v2477_v23, %v1358_v35 }
 0x1e1   :  { %1647 = vpow2.f32 %v1074_v44  ;;  %v1374_v16 = vadd.f32 -1.4531521, %v723_v17  ;;  %v1009_v46 = vsub.f32 0.0, %v2474_v54  ;;  %v528_v8 = vsel %vm496_vm11, 1.0, %v2547_v12 }
 0x1e2   :  { %1298 = vst [vmem:[#allocation7 + $0xf0] sm:$0xff] %v1266_v34  ;;  %v1184_v50 = vmul.f32 %v1152_v60, %v512_v37  ;;  %v912_v63 = vmul.f32 %v2456_v9, %v1403_v56  ;;  %v803_v58 = vadd.f32 1.4214138, %v771_v24  ;;  %1649 = vpow2.f32 %v1106_v33 }
 0x1e3   :  { %v787_v30 = vmul.f32 %v2487_v53, %v1374_v16  ;;  %v1070_v52 = vmul.f32 1.442695, %v1025_v39  ;;  %v1041_v6 = vmul.f32 %v1009_v46, %v2474_v54  ;;  %v432_v40 = vmul.f32 0.5, %v2385_v3 }
 0x1e4   :  { %v1216_v2 = vadd.f32 1.0, %v1184_v50  ;;  %v944_v41 = vadd.f32 0.2548296, %v912_v63  ;;  %v835_v4 = vmul.f32 %v2477_v23, %v803_v58  ;;  %vm483_vm12 = vcmp.ge.f32.partialorder %v2412_v43, 0.0 }
 0x1e5   :  { %v819_v10 = vadd.f32 1.4214138, %v787_v30  ;;  %1651 = vpow2.f32 %v1070_v52  ;;  %v1102_v44 = vmul.f32 1.442695, %v1041_v6  ;;  %v515_v60 = vsel %vm483_vm12, 1.0, %v2547_v12 }
 0x1e6   :  { %v1248_v0 = vmul.f32 %v1216_v2, %v416_v19  ;;  %v976_v5 = vmul.f32 %v2456_v9, %v944_v41  ;;  %v1390_v28 = vadd.f32 -0.28449672, %v835_v4  ;;  %vm499_vm13 = vcmp.ge.f32.partialorder %v2432_v61, 0.0 }
 0x1e7   :  { %v1644_v25 = vpop.eup %1643  ;;  %v851_v13 = vmul.f32 %v2487_v53, %v819_v10  ;;  %1653 = vpow2.f32 %v1102_v44  ;;  %v419_v50 = vmul.f32 0.5, %v2399_v48  ;;  %v435_v61 = vmul.f32 0.5, %v2417_v55 }
 0x1e8   :  { %1280 = vst [vmem:[#allocation7 + $0x60] sm:$0xff] %v1248_v0  ;;  %v1136_v27 = vmul.f32 %v1642_v15, %v976_v5  ;;  %v899_v22 = vmul.f32 %v2477_v23, %v1390_v28  ;;  %v705_v20 = vmul.f32 1.0614054, %v1644_v25  ;;  %v531_v15 = vsel %vm499_vm13, 1.0, %v2547_v12 }
 0x1e9   :  { %v1646_v9 = vpop.eup %1645  ;;  %v1406_v49 = vadd.f32 -0.28449672, %v851_v13  ;;  %vm481_vm14 = vcmp.ge.f32.partialorder %v2460_v36, 0.0  ;;  %vm497_vm15 = vcmp.ge.f32.partialorder %v2467_v59, 0.0 }
 0x1ea   :  { %v1168_v1 = vsub.f32 1.0, %v1136_v27  ;;  %v931_v7 = vadd.f32 0.2548296, %v899_v22  ;;  %v1356_v29 = vadd.f32 -1.4531521, %v705_v20  ;;  %v513_v27 = vsel %vm481_vm14, 1.0, %v2547_v12 }
 0x1eb   :  { %v721_v14 = vmul.f32 1.0614054, %v1646_v9  ;;  %v1648_v62 = vpop.eup %1647  ;;  %v915_v51 = vmul.f32 %v2487_v53, %v1406_v49  ;;  %v417_v20 = vmul.f32 0.5, %v2448_v18 }
 0x1ec   :  { %v1200_v38 = vmul.f32 %v1168_v1, %v528_v8  ;;  %v963_v45 = vmul.f32 %v2477_v23, %v931_v7  ;;  %v769_v47 = vmul.f32 %v1644_v25, %v1356_v29  ;;  %v1650_v3 = vpop.eup %1649  ;;  %v529_v1 = vsel %vm497_vm15, 1.0, %v2547_v12 }
 0x1ed   :  { %v1372_v26 = vadd.f32 -1.4531521, %v721_v14  ;;  %v947_v35 = vadd.f32 0.2548296, %v915_v51  ;;  %v433_v29 = vmul.f32 0.5, %v2452_v21 }
 0x1ee   :  { %v1232_v11 = vadd.f32 1.0, %v1200_v38  ;;  %v1123_v31 = vmul.f32 %v1648_v62, %v963_v45  ;;  %v801_v42 = vadd.f32 1.4214138, %v769_v47 }
 0x1ef   :  { %v785_v23 = vmul.f32 %v1646_v9, %v1372_v26  ;;  %v979_v56 = vmul.f32 %v2487_v53, %v947_v35  ;;  %v1652_v30 = vpop.eup %1651 }
 0x1f0   :  { %v1264_v54 = vmul.f32 %v1232_v11, %v432_v40  ;;  %v1155_v32 = vsub.f32 1.0, %v1123_v31  ;;  %v833_v34 = vmul.f32 %v1644_v25, %v801_v42 }
 0x1f1   :  { %v817_v37 = vadd.f32 1.4214138, %v785_v23  ;;  %v1139_v17 = vmul.f32 %v1650_v3, %v979_v56  ;;  %v1654_v46 = vpop.eup %1653 }
 0x1f2   :  { %1296 = vst [vmem:[#allocation7 + $0xe0] sm:$0xff] %v1264_v54  ;;  %v1187_v43 = vmul.f32 %v1155_v32, %v515_v60  ;;  %v1388_v24 = vadd.f32 -0.28449672, %v833_v34 }
 0x1f3   :  { %v849_v19 = vmul.f32 %v1646_v9, %v817_v37  ;;  %v1171_v16 = vsub.f32 1.0, %v1139_v17 }
 0x1f4   :  { %v1219_v63 = vadd.f32 1.0, %v1187_v43  ;;  %v897_v58 = vmul.f32 %v1644_v25, %v1388_v24 }
 0x1f5   :  { %v1404_v53 = vadd.f32 -0.28449672, %v849_v19  ;;  %v1203_v41 = vmul.f32 %v1171_v16, %v531_v15 }
 0x1f6   :  { %v1251_v57 = vmul.f32 %v1219_v63, %v419_v50  ;;  %v929_v2 = vadd.f32 0.2548296, %v897_v58 }
 0x1f7   :  { %v913_v33 = vmul.f32 %v1646_v9, %v1404_v53  ;;  %v1235_v0 = vadd.f32 1.0, %v1203_v41 }
 0x1f8   :  { %1283 = vst [vmem:[#allocation7 + $0x78] sm:$0xff] %v1251_v57  ;;  %v961_v4 = vmul.f32 %v1644_v25, %v929_v2 }
 0x1f9   :  { %v945_v5 = vadd.f32 0.2548296, %v913_v33  ;;  %v1267_v28 = vmul.f32 %v1235_v0, %v435_v61 }
 0x1fa   :  { %v1121_v48 = vmul.f32 %v1652_v30, %v961_v4 }
 0x1fb   :  { %v977_v39 = vmul.f32 %v1646_v9, %v945_v5  ;;  %1299 = vst [vmem:[#allocation7 + $0xf8] sm:$0xff] %v1267_v28 }
 0x1fc   :  { %v1153_v10 = vsub.f32 1.0, %v1121_v48 }
 0x1fd   :  { %v1137_v25 = vmul.f32 %v1654_v46, %v977_v39 }
 0x1fe   :  { %v1185_v22 = vmul.f32 %v1153_v10, %v513_v27 }
 0x1ff   :  { %v1169_v55 = vsub.f32 1.0, %v1137_v25 }
 0x200   :  { %v1217_v13 = vadd.f32 1.0, %v1185_v22 }
 0x201   :  { %v1201_v7 = vmul.f32 %v1169_v55, %v529_v1 }
 0x202   :  { %v1249_v36 = vmul.f32 %v1217_v13, %v417_v20 }
 0x203   :  { %v1233_v9 = vadd.f32 1.0, %v1201_v7 }
 0x204   :  { %1281 = vst [vmem:[#allocation7 + $0x68] sm:$0xff] %v1249_v36 }
 0x205   :  { %v1265_v8 = vmul.f32 %v1233_v9, %v433_v29 }
 0x207   :  { %1297 = vst [vmem:[#allocation7 + $0xe8] sm:$0xff] %v1265_v8 }
 0x208   :  { %1711 = shalt.err (!%p1708_p6)
}
 0x209   :  { %s1712_s17 = scalar_lea.hbm %s2535_s3, 4096 }
 0x20a   :  { %p1713_p7 = scmp.ne.s32.totalorder %s2535_s3, %s1712_s17  ;;  %p1716_p8 = scmp.lt.u32.totalorder %s1712_s17, %s2535_s3 }
 0x20c   :  { %p1718_p9 = pnand %p1716_p8, %p1713_p7 }
 0x20e   :  { %1721 = shalt.err (!%p1718_p9)
}
 0x20f   :  { %s1734_s22 = smov 128   ;;  %s1735_s23 = smov 8  }
 0x210   :  { %1311 = dma.vmem_to_hbm [thread:$0]  %s1306_s13, 4096, %s2535_s3, [#allocation4], %s1734_s22, %s1734_s22, %s1735_s23  }
 0x211   :  { %1726 = dma.done.wait [#allocation4], 4096  }
 0x212   :  { %1727 = vsyncadd [#allocation4], 4294963200 }
 0x213   :  { %1315 = vsyncpa [#allocation3], 1 }
 0x214   :  { %1316 = vsyncpa [#allocation6], 1 }
 0x215   :  { %1317 = vsyncpa [#allocation4], 1 }

</bundles_post_ra>
